<compile_context>
chip_gen: v7x
topology: tpu7x:2x2x1
jax: 0.10.0
libtpu: 0.0.40
codegen_flags: <defaults>
</compile_context>

<pallas_src>
import functools
import numpy as np
import jax
import jax.numpy as jnp
from jax.experimental import pallas as pl
from jax.experimental.pallas import tpu as pltpu


# ----------------------------------------------------------------------------
# Host-side (numpy) construction of the pooling / interpolation matrices.
# ----------------------------------------------------------------------------
def _adaptive_pool_matrix(out_size, in_size):
    """AdaptiveAvgPool1d matrix M (out,in): M[i,j] = 1/len(bin_i) if j in bin_i."""
    m = np.zeros((out_size, in_size), np.float32)
    for i in range(out_size):
        start = (i * in_size) // out_size
        end = -(-((i + 1) * in_size) // out_size)     # ceil
        m[i, start:end] = 1.0 / (end - start)
    return m


def _bilinear_matrix(out_size, in_size):
    """Bilinear (align_corners=False) interpolation matrix (out, in)."""
    m = np.zeros((out_size, in_size), np.float32)
    for d in range(out_size):
        src = (d + 0.5) * in_size / out_size - 0.5
        src = min(max(src, 0.0), in_size - 1)
        lo = int(np.floor(src))
        hi = min(lo + 1, in_size - 1)
        w_hi = src - lo
        m[d, lo] += 1.0 - w_hi
        m[d, hi] += w_hi
    return m


# ----------------------------------------------------------------------------
# Fused Pallas kernel: all pyramid levels for one batch sample per grid step.
# ----------------------------------------------------------------------------
def ppm_levels_pallas(x_flat, pool_mats, up_mats, ws, bs):
    """x_flat: (N, H*W, Cin) f32.  Returns tuple of L arrays (N, H*W, Cr)."""
    N, HW, Cin = x_flat.shape
    L = len(ws)
    Cr = ws[0].shape[1]

    def kernel(*refs):
        x_ref = refs[0]
        pool_refs = refs[1:1 + L]
        up_refs = refs[1 + L:1 + 2 * L]
        w_refs = refs[1 + 2 * L:1 + 3 * L]
        b_refs = refs[1 + 3 * L:1 + 4 * L]
        out_refs = refs[1 + 4 * L:1 + 5 * L]

        x = x_ref[0]                                              # (HW, Cin)
        for l in range(L):
            # adaptive average pool (exact, via Kron(Ph, Pw))
            pooled = jnp.dot(pool_refs[l][...], x,
                             preferred_element_type=jnp.float32)   # (s2p, Cin)
            # 1x1 conv (bias-free) with eval-mode BN folded in, then ReLU
            y = jnp.dot(pooled, w_refs[l][...],
                        preferred_element_type=jnp.float32) + b_refs[l][...]
            y = jnp.maximum(y, 0.0)                                 # (s2p, Cr)
            # bilinear upsample back to (H, W) (via Kron(Ah, Aw))
            up = jnp.dot(up_refs[l][...], y,
                         preferred_element_type=jnp.float32)        # (HW, Cr)
            out_refs[l][0] = up.astype(out_refs[l].dtype)

    in_specs = [pl.BlockSpec((1, HW, Cin), lambda n: (n, 0, 0))]
    in_specs += [pl.BlockSpec(m.shape, lambda n: (0, 0)) for m in pool_mats]
    in_specs += [pl.BlockSpec(m.shape, lambda n: (0, 0)) for m in up_mats]
    in_specs += [pl.BlockSpec(w.shape, lambda n: (0, 0)) for w in ws]
    in_specs += [pl.BlockSpec(b.shape, lambda n: (0, 0)) for b in bs]
    out_specs = tuple(pl.BlockSpec((1, HW, Cr), lambda n: (n, 0, 0))
                      for _ in range(L))
    out_shape = tuple(jax.ShapeDtypeStruct((N, HW, Cr), x_flat.dtype)
                      for _ in range(L))

    return pl.pallas_call(
        kernel,
        grid=(N,),
        in_specs=in_specs,
        out_specs=out_specs,
        out_shape=out_shape,
        compiler_params=pltpu.CompilerParams(
            # batch samples are independent -> shard across TCs on v7x
            dimension_semantics=("parallel",)),
    )(x_flat, *pool_mats, *up_mats, *ws, *bs)


# ----------------------------------------------------------------------------
# Parameters (shapes match the PyTorch module __init__).
# ----------------------------------------------------------------------------
def init_params(key, in_dim, reduction_dim, setting):
    params = []
    keys = jax.random.split(key, len(setting))
    for k, _ in zip(keys, setting):
        kw, kg, kb, km, kv = jax.random.split(k, 5)
        std = 1.0 / np.sqrt(in_dim)
        params.append({
            # Conv2d(in_dim, reduction_dim, 1, bias=False): weight (Co, Ci)
            'conv_w': jax.random.normal(kw, (reduction_dim, in_dim), jnp.float32) * std,
            'bn_gamma': 1.0 + 0.1 * jax.random.normal(kg, (reduction_dim,), jnp.float32),
            'bn_beta': 0.1 * jax.random.normal(kb, (reduction_dim,), jnp.float32),
            'bn_mean': 0.1 * jax.random.normal(km, (reduction_dim,), jnp.float32),
            'bn_var': 1.0 + 0.1 * jnp.abs(jax.random.normal(kv, (reduction_dim,), jnp.float32)),
        })
    return params


# ----------------------------------------------------------------------------
# Forward (equivalent of _PyramidPoolingModule.forward), NCHW in / NCHW out.
# ----------------------------------------------------------------------------
def ppm_forward(params, x_nchw, setting):
    N, Cin, H, W = x_nchw.shape
    x_nhwc = jnp.transpose(x_nchw, (0, 2, 3, 1)).astype(jnp.float32)
    x_flat = x_nhwc.reshape(N, H * W, Cin)

    pool_mats, up_mats, ws, bs = [], [], [], []
    eps = 1e-5
    for li, s in enumerate(setting):
        s2 = s * s
        s2p = max(8, ((s2 + 7) // 8) * 8)            # pad s^2 to sublane multiple
        # pooling matrix (s2p, H*W); extra rows are zero -> pooled rows are zero
        pm = np.zeros((s2p, H * W), np.float32)
        pm[:s2] = np.kron(_adaptive_pool_matrix(s, H), _adaptive_pool_matrix(s, W))
        # upsample matrix (H*W, s2p); extra cols are zero -> pad rows contribute 0
        um = np.zeros((H * W, s2p), np.float32)
        um[:, :s2] = np.kron(_bilinear_matrix(H, s), _bilinear_matrix(W, s))
        pool_mats.append(jnp.asarray(pm))
        up_mats.append(jnp.asarray(um))

        p = params[li]
        scale = p['bn_gamma'] / jnp.sqrt(p['bn_var'] + eps)
        shift = p['bn_beta'] - p['bn_mean'] * scale
        w_eff = p['conv_w'].T * scale[None, :]       # (Cin, Cr), BN folded
        ws.append(w_eff.astype(jnp.float32))
        bs.append(shift.reshape(1, -1).astype(jnp.float32))

    levels = ppm_levels_pallas(x_flat, pool_mats, up_mats, ws, bs)

    out_flat = jnp.concatenate((x_flat,) + tuple(levels), axis=-1)   # (N, HW, Ctot)
    Ctot = out_flat.shape[-1]
    out = out_flat.reshape(N, H, W, Ctot)
    return jnp.transpose(out, (0, 3, 1, 2))                          # NCHW


if __name__ == "__main__":
    setting = (1, 2, 3, 6)          # classic PSPNet pyramid (16 not divisible by
                                    # 3/6 -> exercises the general adaptive-pool bins)
    in_dim, reduction_dim = 128, 32
    N, H, W = 2, 16, 16

    key = jax.random.PRNGKey(0)
    pkey, xkey = jax.random.split(key)
    params = init_params(pkey, in_dim, reduction_dim, setting)
    x = jax.random.normal(xkey, (N, in_dim, H, W), jnp.float32)

    fwd = jax.jit(functools.partial(ppm_forward, setting=setting))
    out = jax.block_until_ready(fwd(params, x))

    assert out.shape == (N, in_dim + len(setting) * reduction_dim, H, W), out.shape
    assert bool(jnp.all(jnp.isfinite(out)))
    print("KERNEL_OK")
</pallas_src>

<mosaic_0001>
module attributes {stable_mosaic.version = 11 : i64} {
  func.func @kernel(%arg0: i32, %arg1: memref<1x256x128xf32, #tpu.memory_space<vmem>>, %arg2: memref<8x256xf32, #tpu.memory_space<vmem>>, %arg3: memref<8x256xf32, #tpu.memory_space<vmem>>, %arg4: memref<16x256xf32, #tpu.memory_space<vmem>>, %arg5: memref<40x256xf32, #tpu.memory_space<vmem>>, %arg6: memref<256x8xf32, #tpu.memory_space<vmem>>, %arg7: memref<256x8xf32, #tpu.memory_space<vmem>>, %arg8: memref<256x16xf32, #tpu.memory_space<vmem>>, %arg9: memref<256x40xf32, #tpu.memory_space<vmem>>, %arg10: memref<128x32xf32, #tpu.memory_space<vmem>>, %arg11: memref<128x32xf32, #tpu.memory_space<vmem>>, %arg12: memref<128x32xf32, #tpu.memory_space<vmem>>, %arg13: memref<128x32xf32, #tpu.memory_space<vmem>>, %arg14: memref<1x32xf32, #tpu.memory_space<vmem>>, %arg15: memref<1x32xf32, #tpu.memory_space<vmem>>, %arg16: memref<1x32xf32, #tpu.memory_space<vmem>>, %arg17: memref<1x32xf32, #tpu.memory_space<vmem>>, %arg18: memref<1x256x32xf32, #tpu.memory_space<vmem>>, %arg19: memref<1x256x32xf32, #tpu.memory_space<vmem>>, %arg20: memref<1x256x32xf32, #tpu.memory_space<vmem>>, %arg21: memref<1x256x32xf32, #tpu.memory_space<vmem>>) attributes {dimension_semantics = [#tpu.dimension_semantics<parallel>], iteration_bounds = array<i64: 2>, scalar_prefetch = 0 : i64, scratch_operands = 0 : i64, tpu.core_type = #tpu.core_type<tc>, window_params = [{transform_indices = @transform_0, window_bounds = array<i64: 1, 256, 128>}, {pipeline_mode = #tpu.pipeline_mode<synchronous>, transform_indices = @transform_1, window_bounds = array<i64: 8, 256>}, {pipeline_mode = #tpu.pipeline_mode<synchronous>, transform_indices = @transform_2, window_bounds = array<i64: 8, 256>}, {pipeline_mode = #tpu.pipeline_mode<synchronous>, transform_indices = @transform_3, window_bounds = array<i64: 16, 256>}, {pipeline_mode = #tpu.pipeline_mode<synchronous>, transform_indices = @transform_4, window_bounds = array<i64: 40, 256>}, {pipeline_mode = #tpu.pipeline_mode<synchronous>, transform_indices = @transform_5, window_bounds = array<i64: 256, 8>}, {pipeline_mode = #tpu.pipeline_mode<synchronous>, transform_indices = @transform_6, window_bounds = array<i64: 256, 8>}, {pipeline_mode = #tpu.pipeline_mode<synchronous>, transform_indices = @transform_7, window_bounds = array<i64: 256, 16>}, {pipeline_mode = #tpu.pipeline_mode<synchronous>, transform_indices = @transform_8, window_bounds = array<i64: 256, 40>}, {pipeline_mode = #tpu.pipeline_mode<synchronous>, transform_indices = @transform_9, window_bounds = array<i64: 128, 32>}, {pipeline_mode = #tpu.pipeline_mode<synchronous>, transform_indices = @transform_10, window_bounds = array<i64: 128, 32>}, {pipeline_mode = #tpu.pipeline_mode<synchronous>, transform_indices = @transform_11, window_bounds = array<i64: 128, 32>}, {pipeline_mode = #tpu.pipeline_mode<synchronous>, transform_indices = @transform_12, window_bounds = array<i64: 128, 32>}, {pipeline_mode = #tpu.pipeline_mode<synchronous>, transform_indices = @transform_13, window_bounds = array<i64: 1, 32>}, {pipeline_mode = #tpu.pipeline_mode<synchronous>, transform_indices = @transform_14, window_bounds = array<i64: 1, 32>}, {pipeline_mode = #tpu.pipeline_mode<synchronous>, transform_indices = @transform_15, window_bounds = array<i64: 1, 32>}, {pipeline_mode = #tpu.pipeline_mode<synchronous>, transform_indices = @transform_16, window_bounds = array<i64: 1, 32>}, {transform_indices = @transform_17, window_bounds = array<i64: 1, 256, 32>}, {transform_indices = @transform_18, window_bounds = array<i64: 1, 256, 32>}, {transform_indices = @transform_19, window_bounds = array<i64: 1, 256, 32>}, {transform_indices = @transform_20, window_bounds = array<i64: 1, 256, 32>}]} {
    %c0 = arith.constant 0 : index
    %c0_0 = arith.constant 0 : index
    %c0_1 = arith.constant 0 : index
    %0 = vector.load %arg1[%c0, %c0_0, %c0_1] : memref<1x256x128xf32, #tpu.memory_space<vmem>>, vector<1x256x128xf32>
    %1 = vector.shape_cast %0 : vector<1x256x128xf32> to vector<256x128xf32>
    %c0_2 = arith.constant 0 : index
    %c0_3 = arith.constant 0 : index
    %2 = vector.load %arg2[%c0_2, %c0_3] : memref<8x256xf32, #tpu.memory_space<vmem>>, vector<8x256xf32>
    %cst = arith.constant dense<0.000000e+00> : vector<8x128xf32>
    %3 = tpu.matmul %2, %1, %cst {dimension_numbers = #tpu.dot_dimension_numbers<[1], [0], [0], [1], [0, 0, 1, 1], [], []>} : vector<8x256xf32>, vector<256x128xf32>, vector<8x128xf32> -> vector<8x128xf32>
    %c0_4 = arith.constant 0 : index
    %c0_5 = arith.constant 0 : index
    %4 = vector.load %arg10[%c0_4, %c0_5] : memref<128x32xf32, #tpu.memory_space<vmem>>, vector<128x32xf32>
    %cst_6 = arith.constant dense<0.000000e+00> : vector<8x32xf32>
    %5 = tpu.matmul %3, %4, %cst_6 {dimension_numbers = #tpu.dot_dimension_numbers<[1], [0], [0], [1], [0, 0, 1, 1], [], []>} : vector<8x128xf32>, vector<128x32xf32>, vector<8x32xf32> -> vector<8x32xf32>
    %c0_7 = arith.constant 0 : index
    %c0_8 = arith.constant 0 : index
    %6 = vector.load %arg14[%c0_7, %c0_8] : memref<1x32xf32, #tpu.memory_space<vmem>>, vector<1x32xf32>
    %7 = vector.broadcast %6 : vector<1x32xf32> to vector<8x32xf32>
    %8 = arith.addf %5, %7 : vector<8x32xf32>
    %cst_9 = arith.constant 0.000000e+00 : f32
    %9 = vector.broadcast %cst_9 : f32 to vector<8x32xf32>
    %10 = arith.maximumf %8, %9 : vector<8x32xf32>
    %c0_10 = arith.constant 0 : index
    %c0_11 = arith.constant 0 : index
    %11 = vector.load %arg6[%c0_10, %c0_11] : memref<256x8xf32, #tpu.memory_space<vmem>>, vector<256x8xf32>
    %cst_12 = arith.constant dense<0.000000e+00> : vector<256x32xf32>
    %12 = tpu.matmul %11, %10, %cst_12 {dimension_numbers = #tpu.dot_dimension_numbers<[1], [0], [0], [1], [0, 0, 1, 1], [], []>} : vector<256x8xf32>, vector<8x32xf32>, vector<256x32xf32> -> vector<256x32xf32>
    %c0_13 = arith.constant 0 : index
    %c0_14 = arith.constant 0 : index
    %c0_15 = arith.constant 0 : index
    %13 = vector.load %arg18[%c0_13, %c0_14, %c0_15] : memref<1x256x32xf32, #tpu.memory_space<vmem>>, vector<1x256x32xf32>
    %14 = vector.shape_cast %13 : vector<1x256x32xf32> to vector<256x32xf32>
    %15 = vector.shape_cast %12 : vector<256x32xf32> to vector<1x256x32xf32>
    tpu.vector_store %arg18[%c0_13, %c0_14, %c0_15], %15 {strides = array<i32>} : memref<1x256x32xf32, #tpu.memory_space<vmem>>, vector<1x256x32xf32>,
    %c0_16 = arith.constant 0 : index
    %c0_17 = arith.constant 0 : index
    %16 = vector.load %arg3[%c0_16, %c0_17] : memref<8x256xf32, #tpu.memory_space<vmem>>, vector<8x256xf32>
    %cst_18 = arith.constant dense<0.000000e+00> : vector<8x128xf32>
    %17 = tpu.matmul %16, %1, %cst_18 {dimension_numbers = #tpu.dot_dimension_numbers<[1], [0], [0], [1], [0, 0, 1, 1], [], []>} : vector<8x256xf32>, vector<256x128xf32>, vector<8x128xf32> -> vector<8x128xf32>
    %c0_19 = arith.constant 0 : index
    %c0_20 = arith.constant 0 : index
    %18 = vector.load %arg11[%c0_19, %c0_20] : memref<128x32xf32, #tpu.memory_space<vmem>>, vector<128x32xf32>
    %cst_21 = arith.constant dense<0.000000e+00> : vector<8x32xf32>
    %19 = tpu.matmul %17, %18, %cst_21 {dimension_numbers = #tpu.dot_dimension_numbers<[1], [0], [0], [1], [0, 0, 1, 1], [], []>} : vector<8x128xf32>, vector<128x32xf32>, vector<8x32xf32> -> vector<8x32xf32>
    %c0_22 = arith.constant 0 : index
    %c0_23 = arith.constant 0 : index
    %20 = vector.load %arg15[%c0_22, %c0_23] : memref<1x32xf32, #tpu.memory_space<vmem>>, vector<1x32xf32>
    %21 = vector.broadcast %20 : vector<1x32xf32> to vector<8x32xf32>
    %22 = arith.addf %19, %21 : vector<8x32xf32>
    %cst_24 = arith.constant 0.000000e+00 : f32
    %23 = vector.broadcast %cst_24 : f32 to vector<8x32xf32>
    %24 = arith.maximumf %22, %23 : vector<8x32xf32>
    %c0_25 = arith.constant 0 : index
    %c0_26 = arith.constant 0 : index
    %25 = vector.load %arg7[%c0_25, %c0_26] : memref<256x8xf32, #tpu.memory_space<vmem>>, vector<256x8xf32>
    %cst_27 = arith.constant dense<0.000000e+00> : vector<256x32xf32>
    %26 = tpu.matmul %25, %24, %cst_27 {dimension_numbers = #tpu.dot_dimension_numbers<[1], [0], [0], [1], [0, 0, 1, 1], [], []>} : vector<256x8xf32>, vector<8x32xf32>, vector<256x32xf32> -> vector<256x32xf32>
    %c0_28 = arith.constant 0 : index
    %c0_29 = arith.constant 0 : index
    %c0_30 = arith.constant 0 : index
    %27 = vector.load %arg19[%c0_28, %c0_29, %c0_30] : memref<1x256x32xf32, #tpu.memory_space<vmem>>, vector<1x256x32xf32>
    %28 = vector.shape_cast %27 : vector<1x256x32xf32> to vector<256x32xf32>
    %29 = vector.shape_cast %26 : vector<256x32xf32> to vector<1x256x32xf32>
    tpu.vector_store %arg19[%c0_28, %c0_29, %c0_30], %29 {strides = array<i32>} : memref<1x256x32xf32, #tpu.memory_space<vmem>>, vector<1x256x32xf32>,
    %c0_31 = arith.constant 0 : index
    %c0_32 = arith.constant 0 : index
    %30 = vector.load %arg4[%c0_31, %c0_32] : memref<16x256xf32, #tpu.memory_space<vmem>>, vector<16x256xf32>
    %cst_33 = arith.constant dense<0.000000e+00> : vector<16x128xf32>
    %31 = tpu.matmul %30, %1, %cst_33 {dimension_numbers = #tpu.dot_dimension_numbers<[1], [0], [0], [1], [0, 0, 1, 1], [], []>} : vector<16x256xf32>, vector<256x128xf32>, vector<16x128xf32> -> vector<16x128xf32>
    %c0_34 = arith.constant 0 : index
    %c0_35 = arith.constant 0 : index
    %32 = vector.load %arg12[%c0_34, %c0_35] : memref<128x32xf32, #tpu.memory_space<vmem>>, vector<128x32xf32>
    %cst_36 = arith.constant dense<0.000000e+00> : vector<16x32xf32>
    %33 = tpu.matmul %31, %32, %cst_36 {dimension_numbers = #tpu.dot_dimension_numbers<[1], [0], [0], [1], [0, 0, 1, 1], [], []>} : vector<16x128xf32>, vector<128x32xf32>, vector<16x32xf32> -> vector<16x32xf32>
    %c0_37 = arith.constant 0 : index
    %c0_38 = arith.constant 0 : index
    %34 = vector.load %arg16[%c0_37, %c0_38] : memref<1x32xf32, #tpu.memory_space<vmem>>, vector<1x32xf32>
    %35 = vector.broadcast %34 : vector<1x32xf32> to vector<16x32xf32>
    %36 = arith.addf %33, %35 : vector<16x32xf32>
    %cst_39 = arith.constant 0.000000e+00 : f32
    %37 = vector.broadcast %cst_39 : f32 to vector<16x32xf32>
    %38 = arith.maximumf %36, %37 : vector<16x32xf32>
    %c0_40 = arith.constant 0 : index
    %c0_41 = arith.constant 0 : index
    %39 = vector.load %arg8[%c0_40, %c0_41] : memref<256x16xf32, #tpu.memory_space<vmem>>, vector<256x16xf32>
    %cst_42 = arith.constant dense<0.000000e+00> : vector<256x32xf32>
    %40 = tpu.matmul %39, %38, %cst_42 {dimension_numbers = #tpu.dot_dimension_numbers<[1], [0], [0], [1], [0, 0, 1, 1], [], []>} : vector<256x16xf32>, vector<16x32xf32>, vector<256x32xf32> -> vector<256x32xf32>
    %c0_43 = arith.constant 0 : index
    %c0_44 = arith.constant 0 : index
    %c0_45 = arith.constant 0 : index
    %41 = vector.load %arg20[%c0_43, %c0_44, %c0_45] : memref<1x256x32xf32, #tpu.memory_space<vmem>>, vector<1x256x32xf32>
    %42 = vector.shape_cast %41 : vector<1x256x32xf32> to vector<256x32xf32>
    %43 = vector.shape_cast %40 : vector<256x32xf32> to vector<1x256x32xf32>
    tpu.vector_store %arg20[%c0_43, %c0_44, %c0_45], %43 {strides = array<i32>} : memref<1x256x32xf32, #tpu.memory_space<vmem>>, vector<1x256x32xf32>,
    %c0_46 = arith.constant 0 : index
    %c0_47 = arith.constant 0 : index
    %44 = vector.load %arg5[%c0_46, %c0_47] : memref<40x256xf32, #tpu.memory_space<vmem>>, vector<40x256xf32>
    %cst_48 = arith.constant dense<0.000000e+00> : vector<40x128xf32>
    %45 = tpu.matmul %44, %1, %cst_48 {dimension_numbers = #tpu.dot_dimension_numbers<[1], [0], [0], [1], [0, 0, 1, 1], [], []>} : vector<40x256xf32>, vector<256x128xf32>, vector<40x128xf32> -> vector<40x128xf32>
    %c0_49 = arith.constant 0 : index
    %c0_50 = arith.constant 0 : index
    %46 = vector.load %arg13[%c0_49, %c0_50] : memref<128x32xf32, #tpu.memory_space<vmem>>, vector<128x32xf32>
    %cst_51 = arith.constant dense<0.000000e+00> : vector<40x32xf32>
    %47 = tpu.matmul %45, %46, %cst_51 {dimension_numbers = #tpu.dot_dimension_numbers<[1], [0], [0], [1], [0, 0, 1, 1], [], []>} : vector<40x128xf32>, vector<128x32xf32>, vector<40x32xf32> -> vector<40x32xf32>
    %c0_52 = arith.constant 0 : index
    %c0_53 = arith.constant 0 : index
    %48 = vector.load %arg17[%c0_52, %c0_53] : memref<1x32xf32, #tpu.memory_space<vmem>>, vector<1x32xf32>
    %49 = vector.broadcast %48 : vector<1x32xf32> to vector<40x32xf32>
    %50 = arith.addf %47, %49 : vector<40x32xf32>
    %cst_54 = arith.constant 0.000000e+00 : f32
    %51 = vector.broadcast %cst_54 : f32 to vector<40x32xf32>
    %52 = arith.maximumf %50, %51 : vector<40x32xf32>
    %c0_55 = arith.constant 0 : index
    %c0_56 = arith.constant 0 : index
    %53 = vector.load %arg9[%c0_55, %c0_56] : memref<256x40xf32, #tpu.memory_space<vmem>>, vector<256x40xf32>
    %cst_57 = arith.constant dense<0.000000e+00> : vector<256x32xf32>
    %54 = tpu.matmul %53, %52, %cst_57 {dimension_numbers = #tpu.dot_dimension_numbers<[1], [0], [0], [1], [0, 0, 1, 1], [], []>} : vector<256x40xf32>, vector<40x32xf32>, vector<256x32xf32> -> vector<256x32xf32>
    %c0_58 = arith.constant 0 : index
    %c0_59 = arith.constant 0 : index
    %c0_60 = arith.constant 0 : index
    %55 = vector.load %arg21[%c0_58, %c0_59, %c0_60] : memref<1x256x32xf32, #tpu.memory_space<vmem>>, vector<1x256x32xf32>
    %56 = vector.shape_cast %55 : vector<1x256x32xf32> to vector<256x32xf32>
    %57 = vector.shape_cast %54 : vector<256x32xf32> to vector<1x256x32xf32>
    tpu.vector_store %arg21[%c0_58, %c0_59, %c0_60], %57 {strides = array<i32>} : memref<1x256x32xf32, #tpu.memory_space<vmem>>, vector<1x256x32xf32>,
    return
  }
  func.func @transform_0(%arg0: i32) -> (i32, i32, i32) {
    %c0_i32 = arith.constant 0 : i32
    %c0_i32_0 = arith.constant 0 : i32
    %c0_i32_1 = arith.constant 0 : i32
    return %arg0, %c0_i32, %c0_i32_0 : i32, i32, i32
  }
  func.func @transform_1(%arg0: i32) -> (i32, i32) {
    %c0_i32 = arith.constant 0 : i32
    %c0_i32_0 = arith.constant 0 : i32
    %c0_i32_1 = arith.constant 0 : i32
    return %c0_i32, %c0_i32_0 : i32, i32
  }
  func.func @transform_2(%arg0: i32) -> (i32, i32) {
    %c0_i32 = arith.constant 0 : i32
    %c0_i32_0 = arith.constant 0 : i32
    %c0_i32_1 = arith.constant 0 : i32
    return %c0_i32, %c0_i32_0 : i32, i32
  }
  func.func @transform_3(%arg0: i32) -> (i32, i32) {
    %c0_i32 = arith.constant 0 : i32
    %c0_i32_0 = arith.constant 0 : i32
    %c0_i32_1 = arith.constant 0 : i32
    return %c0_i32, %c0_i32_0 : i32, i32
  }
  func.func @transform_4(%arg0: i32) -> (i32, i32) {
    %c0_i32 = arith.constant 0 : i32
    %c0_i32_0 = arith.constant 0 : i32
    %c0_i32_1 = arith.constant 0 : i32
    return %c0_i32, %c0_i32_0 : i32, i32
  }
  func.func @transform_5(%arg0: i32) -> (i32, i32) {
    %c0_i32 = arith.constant 0 : i32
    %c0_i32_0 = arith.constant 0 : i32
    %c0_i32_1 = arith.constant 0 : i32
    return %c0_i32, %c0_i32_0 : i32, i32
  }
  func.func @transform_6(%arg0: i32) -> (i32, i32) {
    %c0_i32 = arith.constant 0 : i32
    %c0_i32_0 = arith.constant 0 : i32
    %c0_i32_1 = arith.constant 0 : i32
    return %c0_i32, %c0_i32_0 : i32, i32
  }
  func.func @transform_7(%arg0: i32) -> (i32, i32) {
    %c0_i32 = arith.constant 0 : i32
    %c0_i32_0 = arith.constant 0 : i32
    %c0_i32_1 = arith.constant 0 : i32
    return %c0_i32, %c0_i32_0 : i32, i32
  }
  func.func @transform_8(%arg0: i32) -> (i32, i32) {
    %c0_i32 = arith.constant 0 : i32
    %c0_i32_0 = arith.constant 0 : i32
    %c0_i32_1 = arith.constant 0 : i32
    return %c0_i32, %c0_i32_0 : i32, i32
  }
  func.func @transform_9(%arg0: i32) -> (i32, i32) {
    %c0_i32 = arith.constant 0 : i32
    %c0_i32_0 = arith.constant 0 : i32
    %c0_i32_1 = arith.constant 0 : i32
    return %c0_i32, %c0_i32_0 : i32, i32
  }
  func.func @transform_10(%arg0: i32) -> (i32, i32) {
    %c0_i32 = arith.constant 0 : i32
    %c0_i32_0 = arith.constant 0 : i32
    %c0_i32_1 = arith.constant 0 : i32
    return %c0_i32, %c0_i32_0 : i32, i32
  }
  func.func @transform_11(%arg0: i32) -> (i32, i32) {
    %c0_i32 = arith.constant 0 : i32
    %c0_i32_0 = arith.constant 0 : i32
    %c0_i32_1 = arith.constant 0 : i32
    return %c0_i32, %c0_i32_0 : i32, i32
  }
  func.func @transform_12(%arg0: i32) -> (i32, i32) {
    %c0_i32 = arith.constant 0 : i32
    %c0_i32_0 = arith.constant 0 : i32
    %c0_i32_1 = arith.constant 0 : i32
    return %c0_i32, %c0_i32_0 : i32, i32
  }
  func.func @transform_13(%arg0: i32) -> (i32, i32) {
    %c0_i32 = arith.constant 0 : i32
    %c0_i32_0 = arith.constant 0 : i32
    %c0_i32_1 = arith.constant 0 : i32
    return %c0_i32, %c0_i32_0 : i32, i32
  }
  func.func @transform_14(%arg0: i32) -> (i32, i32) {
    %c0_i32 = arith.constant 0 : i32
    %c0_i32_0 = arith.constant 0 : i32
    %c0_i32_1 = arith.constant 0 : i32
    return %c0_i32, %c0_i32_0 : i32, i32
  }
  func.func @transform_15(%arg0: i32) -> (i32, i32) {
    %c0_i32 = arith.constant 0 : i32
    %c0_i32_0 = arith.constant 0 : i32
    %c0_i32_1 = arith.constant 0 : i32
    return %c0_i32, %c0_i32_0 : i32, i32
  }
  func.func @transform_16(%arg0: i32) -> (i32, i32) {
    %c0_i32 = arith.constant 0 : i32
    %c0_i32_0 = arith.constant 0 : i32
    %c0_i32_1 = arith.constant 0 : i32
    return %c0_i32, %c0_i32_0 : i32, i32
  }
  func.func @transform_17(%arg0: i32) -> (i32, i32, i32) {
    %c0_i32 = arith.constant 0 : i32
    %c0_i32_0 = arith.constant 0 : i32
    %c0_i32_1 = arith.constant 0 : i32
    return %arg0, %c0_i32, %c0_i32_0 : i32, i32, i32
  }
  func.func @transform_18(%arg0: i32) -> (i32, i32, i32) {
    %c0_i32 = arith.constant 0 : i32
    %c0_i32_0 = arith.constant 0 : i32
    %c0_i32_1 = arith.constant 0 : i32
    return %arg0, %c0_i32, %c0_i32_0 : i32, i32, i32
  }
  func.func @transform_19(%arg0: i32) -> (i32, i32, i32) {
    %c0_i32 = arith.constant 0 : i32
    %c0_i32_0 = arith.constant 0 : i32
    %c0_i32_1 = arith.constant 0 : i32
    return %arg0, %c0_i32, %c0_i32_0 : i32, i32, i32
  }
  func.func @transform_20(%arg0: i32) -> (i32, i32, i32) {
    %c0_i32 = arith.constant 0 : i32
    %c0_i32_0 = arith.constant 0 : i32
    %c0_i32_1 = arith.constant 0 : i32
    return %arg0, %c0_i32, %c0_i32_0 : i32, i32, i32
  }
}

</mosaic_0001>

<bundles_post_ra>
// kernel: ppm_forward.1
= control target key start
LH: loop header
LB: loop body
LE: loop exit
PB: predicated region body
PF: predicated region fallthrough
CT: control target
= control target key end

     0   :  { %s5615_s0 = inlined_call_operand.vmem [shape: f32[2,256,128], index: 0, kind: input, shape index: {}]   ;;  %s5616_s1 = inlined_call_operand.vmem [shape: f32[8,256], index: 1, kind: input, shape index: {}]   ;;  %s5617_s2 = inlined_call_operand.vmem [shape: f32[8,256], index: 2, kind: input, shape index: {}]   ;;  %s5618_s3 = inlined_call_operand.vmem [shape: f32[16,256], index: 3, kind: input, shape index: {}]   ;;  %s5619_s4 = inlined_call_operand.vmem [shape: f32[40,256], index: 4, kind: input, shape index: {}]   ;;  %s5620_s5 = inlined_call_operand.vmem [shape: f32[256,8], index: 5, kind: input, shape index: {}]   ;;  %s5621_s6 = inlined_call_operand.vmem [shape: f32[256,8], index: 6, kind: input, shape index: {}]   ;;  %s5622_s7 = inlined_call_operand.vmem [shape: f32[256,16], index: 7, kind: input, shape index: {}]   ;;  %s5623_s8 = inlined_call_operand.vmem [shape: f32[256,40], index: 8, kind: input, shape index: {}]   ;;  %s5624_s9 = inlined_call_operand.vmem [shape: f32[128,32], index: 9, kind: input, shape index: {}]   ;;  %s5625_s10 = inlined_call_operand.vmem [shape: f32[128,32], index: 10, kind: input, shape index: {}]   ;;  %s5626_s11 = inlined_call_operand.vmem [shape: f32[128,32], index: 11, kind: input, shape index: {}]   ;;  %s5627_s12 = inlined_call_operand.vmem [shape: f32[128,32], index: 12, kind: input, shape index: {}]   ;;  %s5628_s13 = inlined_call_operand.vmem [shape: f32[1,32], index: 13, kind: input, shape index: {}]   ;;  %s5629_s14 = inlined_call_operand.vmem [shape: f32[1,32], index: 14, kind: input, shape index: {}]   ;;  %s5630_s15 = inlined_call_operand.vmem [shape: f32[1,32], index: 15, kind: input, shape index: {}]   ;;  %s5631_s16 = inlined_call_operand.vmem [shape: f32[1,32], index: 16, kind: input, shape index: {}]   ;;  %s5632_s17 = inlined_call_operand.vmem [shape: f32[2,256,32], index: 17, kind: output, shape index: {0}]   ;;  %s5633_s18 = inlined_call_operand.vmem [shape: f32[2,256,32], index: 18, kind: output, shape index: {1}]   ;;  %s5634_s19 = inlined_call_operand.vmem [shape: f32[2,256,32], index: 19, kind: output, shape index: {2}]   ;;  %s5635_s20 = inlined_call_operand.vmem [shape: f32[2,256,32], index: 20, kind: output, shape index: {3}]  }
   0x1   :  { %5641 = sst [smem:[#allocation2_spill]] %s5615_s0 }
   0x2   :  { %5642 = sst [smem:[#allocation3_spill]] %s5616_s1  ;;  %s4380_s1 = smov 0  }
   0x3   :  { %5643 = sst [smem:[#allocation4_spill]] %s5617_s2 }
   0x4   :  { %5644 = sst [smem:[#allocation5_spill]] %s5618_s3 }
   0x5   :  { %5645 = sst [smem:[#allocation6_spill]] %s5619_s4 }
   0x6   :  { %5646 = sst [smem:[#allocation7_spill]] %s5624_s9 }
   0x7 LB: > { %s3126_s22 = sadd.s32 4294967295, %s4270_s1   ;;  %p3130_p0 = scmp.ge.s32.totalorder %s4270_s1, 1  ;;  %s4270_s1 = sphi %s4380_s1, %s31_s1  }
   0x8   : > { %p569_p1 = scmp.lt.s32.totalorder %s4270_s1, 3 }
   0xa   : > { %p570_p2 = pnand %p3130_p0, %p569_p1 }
   0xb   : > { %p642_p3 = scmp.lt.s32.totalorder (!%p570_p2), %s3126_s22, 1  ;;  %s5647_s2 = sld [smem:[#allocation3_spill]] (!%p570_p2)  ;;  %v4272_v2 = vmov (!%p570_p2), 0.0|0.0   ;;  %vm4273_vm0 = vmmov (!%p570_p2), 0   ;;  %vm897_vm1 = vcmask (!%p570_p2), 64512   ;;  %vm1219_vm2 = vcmask (!%p570_p2), 261120  }
   0xc   : > { %573 = sbr.rel (%p570_p2) target bundleno = 1749 (0x6d5), region = 88  ;;  %s5648_s9 = sld [smem:[#allocation7_spill]] (!%p570_p2)  ;;  %4039 = vmatprep.subr.bf16.mxu1 (!%p570_p2), %v4272_v2  ;;  %vm2014_vm3 = vcmask (!%p570_p2), 130048   ;;  %vm2618_vm4 = vcmask (!%p570_p2), 326656  }
   0xd   : > { %s5649_s24 = sld [smem:[#allocation2_spill]] (!%p570_p2)  ;;  %s5650_s30 = sld [smem:[#allocation4_spill]] (!%p570_p2) }
   0xe   : > { %s5651_s27 = sld [smem:[#allocation5_spill]] (!%p570_p2)  ;;  %s5652_s21 = sld [smem:[#allocation6_spill]] (!%p570_p2) }
  0x11   : > { %v700_v0 = vld [vmem:[%s5647_s2 + $0x8] sm:$0xff] (!%p570_p2) }
  0x12   : > { %v771_v1 = vld [vmem:[%s5648_s9] sm:$0xff] (!%p570_p2)  ;;  %765 = vmatprep.mubr.f32.mxu0 (!%p570_p2), %v700_v0  ;;  %v772_v3 = vld [vmem:[%s5648_s9 + $0x8] sm:$0xff] (!%p570_p2)  ;;  %v773_v4 = vld [vmem:[%s5648_s9 + $0x10] sm:$0xff] (!%p570_p2) }
  0x13   : > { %v774_v5 = vld [vmem:[%s5648_s9 + $0x18] sm:$0xff]  ;;  %s5654_s22 = smov (!%p642_p3, %s3126_s22), 1  ;;  %v4040_v6 = vpack.c.bf16 %v772_v3, %v771_v1  ;;  %v775_v8 = vld [vmem:[%s5648_s9 + $0x20] sm:$0xff]  ;;  %v776_v9 = vld [vmem:[%s5648_s9 + $0x28] sm:$0xff] }
  0x14   : > { %s4404_s0 = sshll.u32 %s5654_s22, 8  ;;  %v4043_v7 = vpack.c.bf16 %v774_v5, %v773_v4  ;;  %v4046_v22 = vpack.c.bf16 %v776_v9, %v775_v8  ;;  %v777_v24 = vld [vmem:[%s5648_s9 + $0x30] sm:$0xff]  ;;  %v778_v25 = vld [vmem:[%s5648_s9 + $0x38] sm:$0xff]  ;;  %v779_v33 = vld [vmem:[%s5648_s9 + $0x40] sm:$0xff] }
  0x15   : > { %4041 = vmatpush3.bf16.msra.mxu1 %v4040_v6  ;;  %s4410_s25 = scalar_lea.vmem %s5649_s24, %s4404_s0  ;;  %v4049_v32 = vpack.c.bf16 %v778_v25, %v777_v24  ;;  %v780_v34 = vld [vmem:[%s5648_s9 + $0x48] sm:$0xff]  ;;  %v781_v42 = vld [vmem:[%s5648_s9 + $0x50] sm:$0xff]  ;;  %v782_v43 = vld [vmem:[%s5648_s9 + $0x58] sm:$0xff]  ;;  %s4700_s22 = scalar_lea.vmem %s5632_s17, %s4404_s0 }
  0x16   : > { %4042 = vmatprep.subr.bf16.mxu1 %v4272_v2  ;;  %v683_v10 = vld [vmem:[%s4410_s25 + $0x80] sm:$0xff]  ;;  %v684_v11 = vld [vmem:[%s4410_s25 + $0x88] sm:$0xff]  ;;  %v685_v15 = vld [vmem:[%s4410_s25 + $0x90] sm:$0xff]  ;;  %v4052_v41 = vpack.c.bf16 %v780_v34, %v779_v33  ;;  %v4055_v50 = vpack.c.bf16 %v782_v43, %v781_v42 }
  0x17   : > { %v667_v12 = vld [vmem:[%s4410_s25] sm:$0xff]  ;;  %v4422_v13 = vpack.c.bf16 %v684_v11, %v683_v10  ;;  %v668_v14 = vld [vmem:[%s4410_s25 + $0x8] sm:$0xff]  ;;  %v686_v16 = vld [vmem:[%s4410_s25 + $0x98] sm:$0xff] }
  0x18   : > { %v4427_v17 = vpack.c.bf16 %v668_v14, %v667_v12  ;;  %v4429_v18 = vpack.c.bf16 %v686_v16, %v685_v15  ;;  %v669_v19 = vld [vmem:[%s4410_s25 + $0x10] sm:$0xff]  ;;  %v670_v20 = vld [vmem:[%s4410_s25 + $0x18] sm:$0xff]  ;;  %v687_v21 = vld [vmem:[%s4410_s25 + $0xa0] sm:$0xff]  ;;  %v4274_v12 = vmov 0.0  }
  0x19   : > { %4044 = vmatpush3.bf16.msra.mxu1 %v4043_v7  ;;  %4008 = vmatprep.subr.bf16.mxu0 %v4422_v13  ;;  %v688_v23 = vld [vmem:[%s4410_s25 + $0xa8] sm:$0xff]  ;;  %v4444_v26 = vpack.c.bf16 %v670_v20, %v669_v19  ;;  %v671_v28 = vld [vmem:[%s4410_s25 + $0x20] sm:$0xff]  ;;  %v689_v30 = vld [vmem:[%s4410_s25 + $0xb0] sm:$0xff] }
  0x1a   : > { %4045 = vmatprep.subr.bf16.mxu1 %v4272_v2  ;;  %4010 = vmatpush3.bf16.msra.mxu0 %v4427_v17  ;;  %v4447_v27 = vpack.c.bf16 %v688_v23, %v687_v21  ;;  %v672_v29 = vld [vmem:[%s4410_s25 + $0x28] sm:$0xff]  ;;  %v690_v31 = vld [vmem:[%s4410_s25 + $0xb8] sm:$0xff]  ;;  %v673_v37 = vld [vmem:[%s4410_s25 + $0x30] sm:$0xff] }
  0x1b   : > { %4012 = vmatprep.subr.bf16.mxu0 %v4429_v18  ;;  %v4461_v35 = vpack.c.bf16 %v672_v29, %v671_v28  ;;  %v4464_v36 = vpack.c.bf16 %v690_v31, %v689_v30  ;;  %v674_v38 = vld [vmem:[%s4410_s25 + $0x38] sm:$0xff]  ;;  %v691_v39 = vld [vmem:[%s4410_s25 + $0xc0] sm:$0xff]  ;;  %v692_v40 = vld [vmem:[%s4410_s25 + $0xc8] sm:$0xff]  ;;  %3677 = vmatprep.mubr.msk.f32.mxu1 %vm4273_vm0, %v4274_v12 }
  0x1c   : > { %v4478_v44 = vpack.c.bf16 %v674_v38, %v673_v37  ;;  %v4481_v45 = vpack.c.bf16 %v692_v40, %v691_v39  ;;  %v675_v46 = vld [vmem:[%s4410_s25 + $0x40] sm:$0xff]  ;;  %v676_v47 = vld [vmem:[%s4410_s25 + $0x48] sm:$0xff]  ;;  %v693_v48 = vld [vmem:[%s4410_s25 + $0xd0] sm:$0xff] }
  0x1d   : > { %4047 = vmatpush3.bf16.msra.mxu1 %v4046_v22  ;;  %v694_v49 = vld [vmem:[%s4410_s25 + $0xd8] sm:$0xff]  ;;  %v783_v51 = vld [vmem:[%s5648_s9 + $0x60] sm:$0xff]  ;;  %v784_v52 = vld [vmem:[%s5648_s9 + $0x68] sm:$0xff]  ;;  %v4495_v53 = vpack.c.bf16 %v676_v47, %v675_v46 }
  0x1e   : > { %4048 = vmatprep.subr.bf16.mxu1 %v4272_v2  ;;  %4014 = vmatpush3.bf16.msra.mxu0 %v4444_v26  ;;  %v4498_v54 = vpack.c.bf16 %v694_v49, %v693_v48  ;;  %v677_v55 = vld [vmem:[%s4410_s25 + $0x50] sm:$0xff]  ;;  %v678_v56 = vld [vmem:[%s4410_s25 + $0x58] sm:$0xff]  ;;  %v695_v57 = vld [vmem:[%s4410_s25 + $0xe0] sm:$0xff]  ;;  %v4058_v59 = vpack.c.bf16 %v784_v52, %v783_v51 }
  0x1f   : > { %4016 = vmatprep.subr.bf16.mxu0 %v4447_v27  ;;  %v696_v58 = vld [vmem:[%s4410_s25 + $0xe8] sm:$0xff]  ;;  %v4506_v60 = vpack.c.bf16 %v678_v56, %v677_v55  ;;  %v679_v62 = vld [vmem:[%s4410_s25 + $0x60] sm:$0xff]  ;;  %v697_v0 = vld [vmem:[%s4410_s25 + $0xf0] sm:$0xff] }
  0x20   : > { %v4509_v61 = vpack.c.bf16 %v696_v58, %v695_v57  ;;  %v680_v63 = vld [vmem:[%s4410_s25 + $0x68] sm:$0xff]  ;;  %v698_v1 = vld [vmem:[%s4410_s25 + $0xf8] sm:$0xff]  ;;  %v681_v5 = vld [vmem:[%s4410_s25 + $0x70] sm:$0xff] }
  0x21   : > { %4050 = vmatpush3.bf16.msra.mxu1 %v4049_v32  ;;  %v4517_v3 = vpack.c.bf16 %v680_v63, %v679_v62  ;;  %v4520_v4 = vpack.c.bf16 %v698_v1, %v697_v0  ;;  %v682_v6 = vld [vmem:[%s4410_s25 + $0x78] sm:$0xff]  ;;  %v699_v8 = vld [vmem:[%s5647_s2] sm:$0xff]  ;;  %v785_v9 = vld [vmem:[%s5648_s9 + $0x70] sm:$0xff]  ;;  %s5391_s25 = scalar_lea.vmem %s5634_s19, %s4404_s0 }
  0x22   : > { %4051 = vmatprep.subr.bf16.mxu1 %v4272_v2  ;;  %4018 = vmatpush3.bf16.msra.mxu0 %v4461_v35  ;;  %v4525_v7 = vpack.c.bf16 %v682_v6, %v681_v5  ;;  %v786_v10 = vld [vmem:[%s5648_s9 + $0x78] sm:$0xff]  ;;  %v879_v19 = vld [vmem:[%s5620_s5 + $0x70] sm:$0xff]  ;;  %v3141_v20 = vld [vmem:[%s5628_s13] ss:$0 sm:$0xff]  ;;  %s5275_s9 = scalar_lea.vmem %s5633_s18, %s4404_s0 }
  0x23   : > { %4020 = vmatprep.subr.bf16.mxu0 %v4464_v36  ;;  %v4061_v11 = vpack.c.bf16 %v786_v10, %v785_v9  ;;  %v880_v25 = vld [vmem:[%s5620_s5 + $0x78] sm:$0xff]  ;;  %v881_v28 = vld [vmem:[%s5620_s5 + $0x80] sm:$0xff]  ;;  %v882_v29 = vld [vmem:[%s5620_s5 + $0x88] sm:$0xff] }
  0x24   : > { %v883_v30 = vld [vmem:[%s5620_s5 + $0x90] sm:$0xff]  ;;  %v884_v31 = vld [vmem:[%s5620_s5 + $0x98] sm:$0xff]  ;;  %v885_v32 = vld [vmem:[%s5620_s5 + $0xa0] sm:$0xff] }
  0x25   : > { %4053 = vmatpush3.bf16.msra.mxu1 %v4052_v41  ;;  %v886_v33 = vld [vmem:[%s5620_s5 + $0xa8] sm:$0xff]  ;;  %v887_v34 = vld [vmem:[%s5620_s5 + $0xb0] sm:$0xff]  ;;  %v888_v37 = vld [vmem:[%s5620_s5 + $0xb8] sm:$0xff] }
  0x26   : > { %4054 = vmatprep.subr.bf16.mxu1 %v4272_v2  ;;  %4022 = vmatpush3.bf16.msra.mxu0 %v4478_v44  ;;  %v889_v38 = vld [vmem:[%s5620_s5 + $0xc0] sm:$0xff]  ;;  %v890_v39 = vld [vmem:[%s5620_s5 + $0xc8] sm:$0xff]  ;;  %v891_v40 = vld [vmem:[%s5620_s5 + $0xd0] sm:$0xff] }
  0x27   : > { %4024 = vmatprep.subr.bf16.mxu0 %v4481_v45  ;;  %v892_v41 = vld [vmem:[%s5620_s5 + $0xd8] sm:$0xff]  ;;  %v893_v42 = vld [vmem:[%s5620_s5 + $0xe0] sm:$0xff]  ;;  %v894_v43 = vld [vmem:[%s5620_s5 + $0xe8] sm:$0xff] }
  0x28   : > { %v895_v46 = vld [vmem:[%s5620_s5 + $0xf0] sm:$0xff]  ;;  %v896_v47 = vld [vmem:[%s5620_s5 + $0xf8] sm:$0xff]  ;;  %v1253_v48 = vld [vmem:[%s5650_s30 + $0x8] sm:$0xff] }
  0x29   : > { %4056 = vmatpush3.bf16.msra.mxu1 %v4055_v50  ;;  %v1252_v49 = vld [vmem:[%s5650_s30] sm:$0xff]  ;;  %v1325_v51 = vld [vmem:[%s5625_s10 + $0x8] sm:$0xff]  ;;  %v1326_v55 = vld [vmem:[%s5625_s10 + $0x10] sm:$0xff] }
  0x2a   : > { %4057 = vmatprep.subr.bf16.mxu1 %v4272_v2  ;;  %4026 = vmatpush3.bf16.msra.mxu0 %v4495_v53  ;;  %v1324_v50 = vld [vmem:[%s5625_s10] sm:$0xff]  ;;  %v1327_v56 = vld [vmem:[%s5625_s10 + $0x18] sm:$0xff]  ;;  %v1330_v63 = vld [vmem:[%s5625_s10 + $0x30] sm:$0xff] }
  0x2b   : > { %4028 = vmatprep.subr.bf16.mxu0 %v4498_v54  ;;  %v4096_v52 = vpack.c.bf16 %v1325_v51, %v1324_v50  ;;  %v4099_v57 = vpack.c.bf16 %v1327_v56, %v1326_v55  ;;  %v1328_v58 = vld [vmem:[%s5625_s10 + $0x20] sm:$0xff]  ;;  %v1331_v0 = vld [vmem:[%s5625_s10 + $0x38] sm:$0xff]  ;;  %v1333_v6 = vld [vmem:[%s5625_s10 + $0x48] sm:$0xff] }
  0x2c   : > { %v4105_v1 = vpack.c.bf16 %v1331_v0, %v1330_v63  ;;  %v1332_v5 = vld [vmem:[%s5625_s10 + $0x40] sm:$0xff]  ;;  %v1334_v9 = vld [vmem:[%s5625_s10 + $0x50] sm:$0xff]  ;;  %v1335_v10 = vld [vmem:[%s5625_s10 + $0x58] sm:$0xff] }
  0x2d   : > { %4059 = vmatpush3.bf16.msra.mxu1 %v4058_v59  ;;  %v1329_v59 = vld [vmem:[%s5625_s10 + $0x28] sm:$0xff]  ;;  %v1803_v50 = vld [vmem:[%s5651_s27] sm:$0xff]  ;;  %v1806_v51 = vld [vmem:[%s5651_s27 + $0x18] sm:$0xff] }
  0x2e   : > { %4060 = vmatprep.subr.bf16.mxu1 %v4272_v2  ;;  %4030 = vmatpush3.bf16.msra.mxu0 %v4506_v60  ;;  %v4102_v62 = vpack.c.bf16 %v1329_v59, %v1328_v58  ;;  %v865_v55 = vld [vmem:[%s5620_s5] sm:$0xff]  ;;  %v866_v58 = vld [vmem:[%s5620_s5 + $0x8] sm:$0xff]  ;;  %v1885_v63 = vld [vmem:[%s5626_s11 + $0x18] sm:$0xff] }
  0x2f   : > { %4032 = vmatprep.subr.bf16.mxu0 %v4509_v61  ;;  %v1882_v56 = vld [vmem:[%s5626_s11] sm:$0xff] }
  0x30   : > { %v1886_v0 = vld [vmem:[%s5626_s11 + $0x20] sm:$0xff] }
  0x31   : > { %4062 = vmatpush3.bf16.msra.mxu1 %v4061_v11  ;;  %v4111_v11 = vpack.c.bf16 %v1335_v10, %v1334_v9  ;;  %v1889_v9 = vld [vmem:[%s5626_s11 + $0x38] sm:$0xff] }
  0x32   : > { %4034 = vmatpush3.bf16.msra.mxu0 %v4517_v3 }
  0x33   : > { %4036 = vmatprep.subr.bf16.mxu0 %v4520_v4 }
  0x36   : > { %4038 = vmatpush3.bf16.msra.mxu0 %v4525_v7 }
  0x39   : > { %766 = vmatmul.mubr.f32.vlgmr.msra.gmra.mrb[0].mxu0 %v699_v8  ;;  %v4108_v8 = vpack.c.bf16 %v1333_v6, %v1332_v5  ;;  %v1887_v5 = vld [vmem:[%s5626_s11 + $0x28] sm:$0xff] }
  0x3a   : > { %3682 = vmatprep.mubr.msk.f32.mxu0 %vm897_vm1, %v865_v55  ;;  %v4159_v6 = vpack.c.bf16 %v1887_v5, %v1886_v0  ;;  %v1418_v55 = vld [vmem:[%s5621_s6] sm:$0xff]  ;;  %v2475_v5 = vld [vmem:[%s5627_s12 + $0x38] sm:$0xff] }
 0x10c   : > { %v3312_v14 = vpop.f32.mrb[0].mxu0 }
 0x10d   : > { %v3313_v15 = vpop.f32.mrb[1].mxu0 }
 0x10e   : > { %v3314_v16 = vadd.f32 %v3313_v15, %v3312_v14  ;;  %v1336_v14 = vld [vmem:[%s5625_s10 + $0x60] sm:$0xff]  ;;  %v1337_v15 = vld [vmem:[%s5625_s10 + $0x68] sm:$0xff] }
 0x110   : > { %3678 = vmatmul.mubr.f32.vlgmr.msra.gmra.mrb[0].mxu1 %v3314_v16  ;;  %v4114_v16 = vpack.c.bf16 %v1337_v15, %v1336_v14  ;;  %v1891_v14 = vld [vmem:[%s5626_s11 + $0x48] sm:$0xff] }
 0x111   : > { %3703 = vmatprep.mubr.msk.f32.mxu1 %vm897_vm1, %v879_v19  ;;  %v1338_v19 = vld [vmem:[%s5625_s10 + $0x70] sm:$0xff] }
 0x1e3   : > { %v860_v21 = vpop.f32.mrb[0].mxu1 }
 0x1e4   : > { %v861_v22 = vadd.f32 %v3141_v20, %v860_v21  ;;  %v3679_v23 = vpop.f32.mrb[1].mxu1  ;;  %v1339_v20 = vld [vmem:[%s5625_s10 + $0x78] sm:$0xff] }
 0x1e5   : > { %v4117_v21 = vpack.c.bf16 %v1339_v20, %v1338_v19  ;;  %v1893_v19 = vld [vmem:[%s5626_s11 + $0x58] sm:$0xff] }
 0x1e6   : > { %v864_v24 = vmax.f32 %v861_v22, 0.0 }
 0x1e8   : > { %3680 = vmatprep.subr.mxu0 %v864_v24  ;;  %4251 = vmatprep.subr.mxu1 %v864_v24 }
 0x1e9   : > { %3681 = vmatpush3.msra.mxu0 %v864_v24  ;;  %4252 = vmatpush3.msra.mxu1 %v864_v24 }
 0x1ea   : > { %3704 = vmatmul.mubr.msk.f32.vlgmr.msra.gmra.mrb[2].mxu1 %vm897_vm1, %v880_v25  ;;  %4064 = vmatprep.subr.bf16.mxu1 %v4422_v13 }
 0x1eb   : > { %3706 = vmatprep.mubr.msk.f32.mxu1 %vm897_vm1, %v881_v28  ;;  %4066 = vmatpush3.bf16.msra.mxu1 %v4427_v17 }
 0x1ec   : > { %4068 = vmatprep.subr.bf16.mxu1 %v4429_v18  ;;  %3683 = vmatmul.mubr.msk.f32.vlgmr.msra.gmra.mrb[2].mxu0 %vm897_vm1, %v866_v58 }
 0x1ee   : > { %3707 = vmatmul.mubr.msk.f32.gmra.mrb[4].mxu1 %vm897_vm1, %v882_v29 }
 0x1ef   : > { %3709 = vmatprep.mubr.msk.f32.mxu1 %vm897_vm1, %v883_v30  ;;  %4070 = vmatpush3.bf16.msra.mxu1 %v4444_v26 }
 0x1f0   : > { %4072 = vmatprep.subr.bf16.mxu1 %v4447_v27 }
 0x1f2   : > { %3710 = vmatmul.mubr.msk.f32.gmra.mrb[6].mxu1 %vm897_vm1, %v884_v31 }
 0x1f3   : > { %3712 = vmatprep.mubr.msk.f32.mxu1 %vm897_vm1, %v885_v32  ;;  %4074 = vmatpush3.bf16.msra.mxu1 %v4461_v35 }
 0x1f4   : > { %4076 = vmatprep.subr.bf16.mxu1 %v4464_v36 }
 0x1f6   : > { %3713 = vmatmul.mubr.msk.f32.gmra.mrb[8].mxu1 %vm897_vm1, %v886_v33 }
 0x1f7   : > { %3715 = vmatprep.mubr.msk.f32.mxu1 %vm897_vm1, %v887_v34  ;;  %4078 = vmatpush3.bf16.msra.mxu1 %v4478_v44 }
 0x1f8   : > { %4080 = vmatprep.subr.bf16.mxu1 %v4481_v45 }
 0x1fa   : > { %3716 = vmatmul.mubr.msk.f32.gmra.mrb[10].mxu1 %vm897_vm1, %v888_v37 }
 0x1fb   : > { %3718 = vmatprep.mubr.msk.f32.mxu1 %vm897_vm1, %v889_v38  ;;  %4082 = vmatpush3.bf16.msra.mxu1 %v4495_v53 }
 0x1fc   : > { %4084 = vmatprep.subr.bf16.mxu1 %v4498_v54 }
 0x1fe   : > { %3719 = vmatmul.mubr.msk.f32.gmra.mrb[12].mxu1 %vm897_vm1, %v890_v39 }
 0x1ff   : > { %3721 = vmatprep.mubr.msk.f32.mxu1 %vm897_vm1, %v891_v40  ;;  %4086 = vmatpush3.bf16.msra.mxu1 %v4506_v60 }
 0x200   : > { %4088 = vmatprep.subr.bf16.mxu1 %v4509_v61 }
 0x202   : > { %3722 = vmatmul.mubr.msk.f32.gmra.mrb[14].mxu1 %vm897_vm1, %v892_v41 }
 0x203   : > { %3724 = vmatprep.mubr.msk.f32.mxu1 %vm897_vm1, %v893_v42  ;;  %4090 = vmatpush3.bf16.msra.mxu1 %v4517_v3 }
 0x204   : > { %4092 = vmatprep.subr.bf16.mxu1 %v4520_v4 }
 0x206   : > { %3725 = vmatmul.mubr.msk.f32.gmra.mrb[16].mxu1 %vm897_vm1, %v894_v43 }
 0x207   : > { %3727 = vmatprep.mubr.msk.f32.mxu1 %vm897_vm1, %v895_v46  ;;  %4094 = vmatpush3.bf16.msra.mxu1 %v4525_v7 }
 0x208   : > { %4095 = vmatprep.subr.bf16.mxu1 %v4272_v2 }
 0x20a   : > { %3728 = vmatmul.mubr.msk.f32.gmra.mrb[18].mxu1 %vm897_vm1, %v896_v47 }
 0x20b   : > { %1318 = vmatprep.mubr.f32.mxu1 %v1253_v48 }
 0x20e   : > { %1319 = vmatmul.mubr.f32.vlgmr.msra.gmra.mrb[20].mxu1 %v1252_v49  ;;  %v1804_v49 = vld [vmem:[%s5651_s27 + $0x8] sm:$0xff] }
 0x20f   : > { %3762 = vmatprep.mubr.msk.f32.mxu1 %vm4273_vm0, %v4274_v12  ;;  %4097 = vmatpush3.bf16.msra.mxu1 %v4096_v52  ;;  %v1805_v52 = vld [vmem:[%s5651_s27 + $0x10] sm:$0xff] }
 0x210   : > { %4098 = vmatprep.subr.bf16.mxu1 %v4272_v2 }
 0x213   : > { %4100 = vmatpush3.bf16.msra.mxu1 %v4099_v57  ;;  %v1883_v57 = vld [vmem:[%s5626_s11 + $0x8] sm:$0xff] }
 0x214   : > { %4101 = vmatprep.subr.bf16.mxu1 %v4272_v2  ;;  %v4151_v59 = vpack.c.bf16 %v1883_v57, %v1882_v56  ;;  %v2470_v56 = vld [vmem:[%s5627_s12 + $0x10] sm:$0xff]  ;;  %v2471_v57 = vld [vmem:[%s5627_s12 + $0x18] sm:$0xff] }
 0x215   : > { %v4223_v58 = vpack.c.bf16 %v2471_v57, %v2470_v56 }
 0x217   : > { %4103 = vmatpush3.bf16.msra.mxu1 %v4102_v62  ;;  %v1884_v62 = vld [vmem:[%s5626_s11 + $0x10] sm:$0xff] }
 0x218   : > { %4104 = vmatprep.subr.bf16.mxu1 %v4272_v2 }
 0x21b   : > { %4106 = vmatpush3.bf16.msra.mxu1 %v4105_v1  ;;  %v4155_v1 = vpack.c.bf16 %v1885_v63, %v1884_v62  ;;  %v2472_v62 = vld [vmem:[%s5627_s12 + $0x20] sm:$0xff]  ;;  %v2473_v63 = vld [vmem:[%s5627_s12 + $0x28] sm:$0xff] }
 0x21c   : > { %4107 = vmatprep.subr.bf16.mxu1 %v4272_v2  ;;  %v4226_v0 = vpack.c.bf16 %v2473_v63, %v2472_v62 }
 0x21f   : > { %4109 = vmatpush3.bf16.msra.mxu1 %v4108_v8  ;;  %v1888_v8 = vld [vmem:[%s5626_s11 + $0x30] sm:$0xff] }
 0x220   : > { %4110 = vmatprep.subr.bf16.mxu1 %v4272_v2  ;;  %v4163_v10 = vpack.c.bf16 %v1889_v9, %v1888_v8  ;;  %v2476_v8 = vld [vmem:[%s5627_s12 + $0x40] sm:$0xff]  ;;  %v2477_v9 = vld [vmem:[%s5627_s12 + $0x48] sm:$0xff] }
 0x223   : > { %4112 = vmatpush3.bf16.msra.mxu1 %v4111_v11  ;;  %v1890_v11 = vld [vmem:[%s5626_s11 + $0x40] sm:$0xff] }
 0x224   : > { %4113 = vmatprep.subr.bf16.mxu1 %v4272_v2  ;;  %v4167_v15 = vpack.c.bf16 %v1891_v14, %v1890_v11  ;;  %v2478_v11 = vld [vmem:[%s5627_s12 + $0x50] sm:$0xff]  ;;  %v2479_v14 = vld [vmem:[%s5627_s12 + $0x58] sm:$0xff] }
 0x227   : > { %4115 = vmatpush3.bf16.msra.mxu1 %v4114_v16  ;;  %v1892_v16 = vld [vmem:[%s5626_s11 + $0x50] sm:$0xff] }
 0x228   : > { %4116 = vmatprep.subr.bf16.mxu1 %v4272_v2  ;;  %v4171_v20 = vpack.c.bf16 %v1893_v19, %v1892_v16  ;;  %v2480_v16 = vld [vmem:[%s5627_s12 + $0x60] sm:$0xff]  ;;  %v2481_v19 = vld [vmem:[%s5627_s12 + $0x68] sm:$0xff] }
 0x22b   : > { %4118 = vmatpush3.bf16.msra.mxu1 %v4117_v21  ;;  %v1894_v21 = vld [vmem:[%s5626_s11 + $0x60] sm:$0xff] }
 0x22c   : > { %4120 = vmatprep.subr.bf16.mxu1 %v4422_v13 }
 0x2bd   : > { %v3705_v22 = vpop.f32.mrb[2].mxu1 }
 0x2be   : > { %1235 = vst.msk [vmem:[%s4700_s22 + $0x78] sm:$0xff] %vm1219_vm2, %v3705_v22  ;;  %v1130_v23 = vpop.f32.mrb[3].mxu1  ;;  %v1895_v22 = vld [vmem:[%s5626_s11 + $0x68] sm:$0xff] }
 0x2bf   : > { %1234 = vst.msk [vmem:[%s4700_s22 + $0x70] sm:$0xff] %vm1219_vm2, %v1130_v23  ;;  %v4175_v23 = vpack.c.bf16 %v1895_v22, %v1894_v21  ;;  %v2482_v21 = vld [vmem:[%s5627_s12 + $0x70] sm:$0xff]  ;;  %v2483_v22 = vld [vmem:[%s5627_s12 + $0x78] sm:$0xff] }
 0x2c1   : > { %v3708_v24 = vpop.f32.mrb[4].mxu1 }
 0x2c2   : > { %1237 = vst.msk [vmem:[%s4700_s22 + $0x88] sm:$0xff] %vm1219_vm2, %v3708_v24  ;;  %v1140_v25 = vpop.f32.mrb[5].mxu1  ;;  %v1896_v24 = vld [vmem:[%s5626_s11 + $0x70] sm:$0xff] }
 0x2c3   : > { %1236 = vst.msk [vmem:[%s4700_s22 + $0x80] sm:$0xff] %vm1219_vm2, %v1140_v25  ;;  %v1897_v25 = vld [vmem:[%s5626_s11 + $0x78] sm:$0xff] }
 0x2c5   : > { %v3711_v28 = vpop.f32.mrb[6].mxu1 }
 0x2c6   : > { %1239 = vst.msk [vmem:[%s4700_s22 + $0x98] sm:$0xff] %vm1219_vm2, %v3711_v28  ;;  %v1150_v29 = vpop.f32.mrb[7].mxu1  ;;  %v4179_v28 = vpack.c.bf16 %v1897_v25, %v1896_v24  ;;  %v1420_v24 = vld [vmem:[%s5621_s6 + $0x10] sm:$0xff]  ;;  %v1421_v25 = vld [vmem:[%s5621_s6 + $0x18] sm:$0xff] }
 0x2c7   : > { %1238 = vst.msk [vmem:[%s4700_s22 + $0x90] sm:$0xff] %vm1219_vm2, %v1150_v29  ;;  %v867_v29 = vld [vmem:[%s5620_s5 + $0x10] sm:$0xff] }
 0x2c8   : > { %3685 = vmatprep.mubr.msk.f32.mxu0 %vm897_vm1, %v867_v29  ;;  %v1424_v29 = vld [vmem:[%s5621_s6 + $0x30] sm:$0xff] }
 0x2c9   : > { %v3714_v30 = vpop.f32.mrb[8].mxu1 }
 0x2ca   : > { %1241 = vst.msk [vmem:[%s4700_s22 + $0xa8] sm:$0xff] %vm1219_vm2, %v3714_v30  ;;  %v1160_v31 = vpop.f32.mrb[9].mxu1  ;;  %v868_v30 = vld [vmem:[%s5620_s5 + $0x18] sm:$0xff] }
 0x2cb   : > { %1240 = vst.msk [vmem:[%s4700_s22 + $0xa0] sm:$0xff] %vm1219_vm2, %v1160_v31  ;;  %v869_v31 = vld [vmem:[%s5620_s5 + $0x20] sm:$0xff]  ;;  %3686 = vmatmul.mubr.msk.f32.gmra.mrb[4].mxu0 %vm897_vm1, %v868_v30  ;;  %v1425_v30 = vld [vmem:[%s5621_s6 + $0x38] sm:$0xff] }
 0x2cc   : > { %3688 = vmatprep.mubr.msk.f32.mxu0 %vm897_vm1, %v869_v31  ;;  %v1426_v31 = vld [vmem:[%s5621_s6 + $0x40] sm:$0xff] }
 0x2cd   : > { %v3717_v32 = vpop.f32.mrb[10].mxu1 }
 0x2ce   : > { %1243 = vst.msk [vmem:[%s4700_s22 + $0xb8] sm:$0xff] %vm1219_vm2, %v3717_v32  ;;  %v1170_v33 = vpop.f32.mrb[11].mxu1  ;;  %v871_v32 = vld [vmem:[%s5620_s5 + $0x30] sm:$0xff] }
 0x2cf   : > { %1242 = vst.msk [vmem:[%s4700_s22 + $0xb0] sm:$0xff] %vm1219_vm2, %v1170_v33  ;;  %v872_v33 = vld [vmem:[%s5620_s5 + $0x38] sm:$0xff] }
 0x2d1   : > { %v3720_v34 = vpop.f32.mrb[12].mxu1 }
 0x2d2   : > { %1245 = vst.msk [vmem:[%s4700_s22 + $0xc8] sm:$0xff] %vm1219_vm2, %v3720_v34  ;;  %v1180_v37 = vpop.f32.mrb[13].mxu1  ;;  %v873_v34 = vld [vmem:[%s5620_s5 + $0x40] sm:$0xff] }
 0x2d3   : > { %1244 = vst.msk [vmem:[%s4700_s22 + $0xc0] sm:$0xff] %vm1219_vm2, %v1180_v37  ;;  %v874_v37 = vld [vmem:[%s5620_s5 + $0x48] sm:$0xff] }
 0x2d5   : > { %v3723_v38 = vpop.f32.mrb[14].mxu1 }
 0x2d6   : > { %1247 = vst.msk [vmem:[%s4700_s22 + $0xd8] sm:$0xff] %vm1219_vm2, %v3723_v38  ;;  %v1190_v39 = vpop.f32.mrb[15].mxu1  ;;  %v875_v38 = vld [vmem:[%s5620_s5 + $0x50] sm:$0xff] }
 0x2d7   : > { %1246 = vst.msk [vmem:[%s4700_s22 + $0xd0] sm:$0xff] %vm1219_vm2, %v1190_v39  ;;  %v3174_v39 = vld [vmem:[%s5629_s14] ss:$0 sm:$0xff] }
 0x2d9   : > { %v3726_v40 = vpop.f32.mrb[16].mxu1 }
 0x2da   : > { %1249 = vst.msk [vmem:[%s4700_s22 + $0xe8] sm:$0xff] %vm1219_vm2, %v3726_v40  ;;  %v1200_v41 = vpop.f32.mrb[17].mxu1 }
 0x2db   : > { %1248 = vst.msk [vmem:[%s4700_s22 + $0xe0] sm:$0xff] %vm1219_vm2, %v1200_v41 }
 0x2dd   : > { %v3729_v42 = vpop.f32.mrb[18].mxu1 }
 0x2de   : > { %1251 = vst.msk [vmem:[%s4700_s22 + $0xf8] sm:$0xff] %vm1219_vm2, %v3729_v42  ;;  %v1210_v43 = vpop.f32.mrb[19].mxu1 }
 0x2df   : > { %1250 = vst.msk [vmem:[%s4700_s22 + $0xf0] sm:$0xff] %vm1219_vm2, %v1210_v43 }
 0x2e1   : > { %v3397_v46 = vpop.f32.mrb[20].mxu1 }
 0x2e2   : > { %v3398_v47 = vpop.f32.mrb[21].mxu1 }
 0x2e3   : > { %v3399_v48 = vadd.f32 %v3398_v47, %v3397_v46 }
 0x2e5   : > { %3763 = vmatmul.mubr.f32.vlgmr.msra.gmra.mrb[22].mxu1 %v3399_v48 }
 0x2e6   : > { %4122 = vmatpush3.bf16.msra.mxu1 %v4427_v17  ;;  %1871 = vmatprep.mubr.f32.mxu1 %v1804_v49 }
 0x2e7   : > { %4124 = vmatprep.subr.bf16.mxu1 %v4429_v18 }
 0x2ea   : > { %4126 = vmatpush3.bf16.msra.mxu1 %v4444_v26 }
 0x2eb   : > { %4128 = vmatprep.subr.bf16.mxu1 %v4447_v27 }
 0x2ee   : > { %4130 = vmatpush3.bf16.msra.mxu1 %v4461_v35 }
 0x2ef   : > { %4132 = vmatprep.subr.bf16.mxu1 %v4464_v36 }
 0x2f2   : > { %4134 = vmatpush3.bf16.msra.mxu1 %v4478_v44 }
 0x2f3   : > { %4136 = vmatprep.subr.bf16.mxu1 %v4481_v45 }
 0x2f6   : > { %4138 = vmatpush3.bf16.msra.mxu1 %v4495_v53 }
 0x2f7   : > { %4140 = vmatprep.subr.bf16.mxu1 %v4498_v54 }
 0x2fa   : > { %4142 = vmatpush3.bf16.msra.mxu1 %v4506_v60 }
 0x2fb   : > { %4144 = vmatprep.subr.bf16.mxu1 %v4509_v61 }
 0x2fe   : > { %4146 = vmatpush3.bf16.msra.mxu1 %v4517_v3 }
 0x2ff   : > { %4148 = vmatprep.subr.bf16.mxu1 %v4520_v4 }
 0x302   : > { %4150 = vmatpush3.bf16.msra.mxu1 %v4525_v7 }
 0x303   : > { %4152 = vmatprep.subr.bf16.mxu1 %v4151_v59 }
 0x305   : > { %1872 = vmatmul.mubr.f32.vlgmr.msra.gmra.mrb[24].mxu1 %v1803_v50 }
 0x306   : > { %1876 = vmatprep.mubr.f32.mxu1 %v1806_v51  ;;  %4154 = vmatpush3.bf16.msra.mxu1 %v4151_v59  ;;  %v1419_v59 = vld [vmem:[%s5621_s6 + $0x8] sm:$0xff] }
 0x307   : > { %4156 = vmatprep.subr.bf16.mxu1 %v4155_v1 }
 0x309   : > { %1877 = vmatmul.mubr.f32.gmra.mrb[26].mxu1 %v1805_v52  ;;  %v2369_v52 = vld [vmem:[%s5652_s21 + $0x8] sm:$0xff] }
 0x30a   : > { %4158 = vmatpush3.bf16.msra.mxu1 %v4155_v1  ;;  %v2474_v1 = vld [vmem:[%s5627_s12 + $0x30] sm:$0xff] }
 0x30b   : > { %4160 = vmatprep.subr.bf16.mxu1 %v4159_v6 }
 0x30e   : > { %4162 = vmatpush3.bf16.msra.mxu1 %v4159_v6  ;;  %v4229_v6 = vpack.c.bf16 %v2475_v5, %v2474_v1  ;;  %v1446_v5 = vld [vmem:[%s5621_s6 + $0xe0] sm:$0xff] }
 0x30f   : > { %4164 = vmatprep.subr.bf16.mxu1 %v4163_v10 }
 0x312   : > { %4166 = vmatpush3.bf16.msra.mxu1 %v4163_v10  ;;  %v4232_v10 = vpack.c.bf16 %v2477_v9, %v2476_v8  ;;  %v1448_v8 = vld [vmem:[%s5621_s6 + $0xf0] sm:$0xff]  ;;  %v1982_v9 = vld [vmem:[%s5622_s7] sm:$0xff] }
 0x313   : > { %4168 = vmatprep.subr.bf16.mxu1 %v4167_v15 }
 0x316   : > { %4170 = vmatpush3.bf16.msra.mxu1 %v4167_v15  ;;  %v4235_v15 = vpack.c.bf16 %v2479_v14, %v2478_v11  ;;  %v1984_v11 = vld [vmem:[%s5622_s7 + $0x10] sm:$0xff]  ;;  %v1985_v14 = vld [vmem:[%s5622_s7 + $0x18] sm:$0xff] }
 0x317   : > { %4172 = vmatprep.subr.bf16.mxu1 %v4171_v20 }
 0x31a   : > { %4174 = vmatpush3.bf16.msra.mxu1 %v4171_v20  ;;  %v4238_v20 = vpack.c.bf16 %v2481_v19, %v2480_v16  ;;  %v1987_v16 = vld [vmem:[%s5622_s7 + $0x28] sm:$0xff]  ;;  %v1988_v19 = vld [vmem:[%s5622_s7 + $0x30] sm:$0xff] }
 0x31b   : > { %4176 = vmatprep.subr.bf16.mxu1 %v4175_v23 }
 0x31e   : > { %4178 = vmatpush3.bf16.msra.mxu1 %v4175_v23  ;;  %v4241_v23 = vpack.c.bf16 %v2483_v22, %v2482_v21  ;;  %v1990_v21 = vld [vmem:[%s5622_s7 + $0x40] sm:$0xff]  ;;  %v1991_v22 = vld [vmem:[%s5622_s7 + $0x48] sm:$0xff] }
 0x31f   : > { %4180 = vmatprep.subr.bf16.mxu1 %v4179_v28 }
 0x322   : > { %4182 = vmatpush3.bf16.msra.mxu1 %v4179_v28  ;;  %v1423_v28 = vld [vmem:[%s5621_s6 + $0x28] sm:$0xff] }
 0x323   : > { %4188 = vmatprep.subr.bf16.mxu1 %v4422_v13  ;;  %v870_v13 = vld [vmem:[%s5620_s5 + $0x28] sm:$0xff] }
 0x324   : > { %3689 = vmatmul.mubr.msk.f32.gmra.mrb[6].mxu0 %vm897_vm1, %v870_v13  ;;  %v1427_v13 = vld [vmem:[%s5621_s6 + $0x48] sm:$0xff] }
 0x325   : > { %3691 = vmatprep.mubr.msk.f32.mxu0 %vm897_vm1, %v871_v32  ;;  %v1428_v32 = vld [vmem:[%s5621_s6 + $0x50] sm:$0xff] }
 0x328   : > { %3692 = vmatmul.mubr.msk.f32.gmra.mrb[8].mxu0 %vm897_vm1, %v872_v33  ;;  %v1429_v33 = vld [vmem:[%s5621_s6 + $0x58] sm:$0xff] }
 0x329   : > { %3694 = vmatprep.mubr.msk.f32.mxu0 %vm897_vm1, %v873_v34  ;;  %v1430_v34 = vld [vmem:[%s5621_s6 + $0x60] sm:$0xff] }
 0x32c   : > { %3695 = vmatmul.mubr.msk.f32.gmra.mrb[10].mxu0 %vm897_vm1, %v874_v37  ;;  %v1431_v37 = vld [vmem:[%s5621_s6 + $0x68] sm:$0xff] }
 0x32d   : > { %3697 = vmatprep.mubr.msk.f32.mxu0 %vm897_vm1, %v875_v38  ;;  %v1432_v38 = vld [vmem:[%s5621_s6 + $0x70] sm:$0xff] }
 0x3b8   : > { %v1413_v40 = vpop.f32.mrb[22].mxu1 }
 0x3b9   : > { %v1414_v41 = vadd.f32 %v3174_v39, %v1413_v40  ;;  %v3764_v42 = vpop.f32.mrb[23].mxu1  ;;  %v1433_v39 = vld [vmem:[%s5621_s6 + $0x78] sm:$0xff]  ;;  %v1434_v40 = vld [vmem:[%s5621_s6 + $0x80] sm:$0xff] }
 0x3ba   : > { %v1436_v42 = vld [vmem:[%s5621_s6 + $0x90] sm:$0xff] }
 0x3bb   : > { %v1417_v43 = vmax.f32 %v1414_v41, 0.0  ;;  %v1435_v41 = vld [vmem:[%s5621_s6 + $0x88] sm:$0xff] }
 0x3bd   : > { %3765 = vmatprep.subr.mxu0 %v1417_v43 }
 0x3be   : > { %3766 = vmatpush3.msra.mxu0 %v1417_v43  ;;  %v1437_v43 = vld [vmem:[%s5621_s6 + $0x98] sm:$0xff] }
 0x3d8   : > { %v3482_v46 = vpop.f32.mrb[24].mxu1 }
 0x3d9   : > { %v3483_v47 = vpop.f32.mrb[25].mxu1 }
 0x3da   : > { %v3484_v48 = vadd.f32 %v3483_v47, %v3482_v46  ;;  %v1438_v46 = vld [vmem:[%s5621_s6 + $0xa0] sm:$0xff]  ;;  %v1439_v47 = vld [vmem:[%s5621_s6 + $0xa8] sm:$0xff] }
 0x3dc   : > { %v3485_v49 = vpop.f32.mrb[26].mxu1  ;;  %3847 = vmatprep.mubr.f32.mxu1 %v3484_v48  ;;  %v1440_v48 = vld [vmem:[%s5621_s6 + $0xb0] sm:$0xff] }
 0x3dd   : > { %v3486_v50 = vpop.f32.mrb[27].mxu1 }
 0x3de   : > { %v3487_v51 = vadd.f32 %v3486_v50, %v3485_v49  ;;  %v1441_v49 = vld [vmem:[%s5621_s6 + $0xb8] sm:$0xff]  ;;  %v1442_v50 = vld [vmem:[%s5621_s6 + $0xc0] sm:$0xff] }
 0x3e0   : > { %3848 = vmatmul.mubr.f32.vlgmr.msra.gmra.mrb[28].mxu1 %v3487_v51  ;;  %v1443_v51 = vld [vmem:[%s5621_s6 + $0xc8] sm:$0xff] }
 0x3e1   : > { %4190 = vmatpush3.bf16.msra.mxu1 %v4427_v17  ;;  %2442 = vmatprep.mubr.f32.mxu1 %v2369_v52  ;;  %v2368_v17 = vld [vmem:[%s5652_s21] sm:$0xff]  ;;  %v1444_v52 = vld [vmem:[%s5621_s6 + $0xd0] sm:$0xff] }
 0x3e2   : > { %4192 = vmatprep.subr.bf16.mxu1 %v4429_v18  ;;  %v2371_v18 = vld [vmem:[%s5652_s21 + $0x18] sm:$0xff] }
 0x3e5   : > { %4194 = vmatpush3.bf16.msra.mxu1 %v4444_v26  ;;  %v2370_v26 = vld [vmem:[%s5652_s21 + $0x10] sm:$0xff] }
 0x3e6   : > { %4196 = vmatprep.subr.bf16.mxu1 %v4447_v27  ;;  %v2373_v27 = vld [vmem:[%s5652_s21 + $0x28] sm:$0xff] }
 0x3e9   : > { %4198 = vmatpush3.bf16.msra.mxu1 %v4461_v35  ;;  %v2372_v35 = vld [vmem:[%s5652_s21 + $0x20] sm:$0xff] }
 0x3ea   : > { %4200 = vmatprep.subr.bf16.mxu1 %v4464_v36  ;;  %v2375_v36 = vld [vmem:[%s5652_s21 + $0x38] sm:$0xff] }
 0x3ed   : > { %4202 = vmatpush3.bf16.msra.mxu1 %v4478_v44  ;;  %v2374_v44 = vld [vmem:[%s5652_s21 + $0x30] sm:$0xff] }
 0x3ee   : > { %4204 = vmatprep.subr.bf16.mxu1 %v4481_v45  ;;  %v2377_v45 = vld [vmem:[%s5652_s21 + $0x48] sm:$0xff] }
 0x3f1   : > { %4206 = vmatpush3.bf16.msra.mxu1 %v4495_v53  ;;  %v2376_v53 = vld [vmem:[%s5652_s21 + $0x40] sm:$0xff] }
 0x3f2   : > { %4208 = vmatprep.subr.bf16.mxu1 %v4498_v54  ;;  %v876_v54 = vld [vmem:[%s5620_s5 + $0x58] sm:$0xff] }
 0x3f3   : > { %3698 = vmatmul.mubr.msk.f32.gmra.mrb[12].mxu0 %vm897_vm1, %v876_v54 }
 0x3f5   : > { %4210 = vmatpush3.bf16.msra.mxu1 %v4506_v60  ;;  %v2468_v60 = vld [vmem:[%s5627_s12] sm:$0xff] }
 0x3f6   : > { %4212 = vmatprep.subr.bf16.mxu1 %v4509_v61  ;;  %v2469_v61 = vld [vmem:[%s5627_s12 + $0x8] sm:$0xff] }
 0x3f9   : > { %4214 = vmatpush3.bf16.msra.mxu1 %v4517_v3  ;;  %v4220_v3 = vpack.c.bf16 %v2469_v61, %v2468_v60 }
 0x3fa   : > { %4216 = vmatprep.subr.bf16.mxu1 %v4520_v4  ;;  %v877_v4 = vld [vmem:[%s5620_s5 + $0x60] sm:$0xff] }
 0x3fb   : > { %3700 = vmatprep.mubr.msk.f32.mxu0 %vm897_vm1, %v877_v4 }
 0x3fd   : > { %4218 = vmatpush3.bf16.msra.mxu1 %v4525_v7  ;;  %v878_v7 = vld [vmem:[%s5620_s5 + $0x68] sm:$0xff] }
 0x3fe   : > { %4219 = vmatprep.subr.bf16.mxu1 %v4272_v2  ;;  %3701 = vmatmul.mubr.msk.f32.gmra.mrb[14].mxu0 %vm897_vm1, %v878_v7 }
 0x3ff   : > { %3767 = vmatprep.mubr.msk.f32.mxu0 %vm897_vm1, %v1418_v55 }
 0x400   : > { %2443 = vmatmul.mubr.f32.vlgmr.msra.gmra.mrb[30].mxu1 %v2368_v17  ;;  %v1445_v17 = vld [vmem:[%s5621_s6 + $0xd8] sm:$0xff] }
 0x401   : > { %2447 = vmatprep.mubr.f32.mxu1 %v2371_v18  ;;  %4221 = vmatpush3.bf16.msra.mxu1 %v4220_v3  ;;  %v3207_v18 = vld [vmem:[%s5630_s15] ss:$0 sm:$0xff] }
 0x402   : > { %4222 = vmatprep.subr.bf16.mxu1 %v4272_v2  ;;  %3768 = vmatmul.mubr.msk.f32.vlgmr.msra.gmra.mrb[16].mxu0 %vm897_vm1, %v1419_v59 }
 0x403   : > { %3770 = vmatprep.mubr.msk.f32.mxu0 %vm897_vm1, %v1420_v24  ;;  %v1993_v24 = vld [vmem:[%s5622_s7 + $0x58] sm:$0xff] }
 0x404   : > { %2448 = vmatmul.mubr.f32.gmra.mrb[32].mxu1 %v2370_v26 }
 0x405   : > { %2452 = vmatprep.mubr.f32.mxu1 %v2373_v27  ;;  %4224 = vmatpush3.bf16.msra.mxu1 %v4223_v58 }
 0x406   : > { %4225 = vmatprep.subr.bf16.mxu1 %v4272_v2  ;;  %3771 = vmatmul.mubr.msk.f32.gmra.mrb[18].mxu0 %vm897_vm1, %v1421_v25  ;;  %v1994_v25 = vld [vmem:[%s5622_s7 + $0x60] sm:$0xff] }
 0x408   : > { %2453 = vmatmul.mubr.f32.gmra.mrb[34].mxu1 %v2372_v35 }
 0x409   : > { %2457 = vmatprep.mubr.f32.mxu1 %v2375_v36  ;;  %4227 = vmatpush3.bf16.msra.mxu1 %v4226_v0 }
 0x40a   : > { %4228 = vmatprep.subr.bf16.mxu1 %v4272_v2 }
 0x40c   : > { %2458 = vmatmul.mubr.f32.gmra.mrb[36].mxu1 %v2374_v44 }
 0x40d   : > { %2462 = vmatprep.mubr.f32.mxu1 %v2377_v45  ;;  %4230 = vmatpush3.bf16.msra.mxu1 %v4229_v6  ;;  %v1447_v6 = vld [vmem:[%s5621_s6 + $0xe8] sm:$0xff] }
 0x40e   : > { %4231 = vmatprep.subr.bf16.mxu1 %v4272_v2 }
 0x410   : > { %2463 = vmatmul.mubr.f32.gmra.mrb[38].mxu1 %v2376_v53 }
 0x411   : > { %3934 = vmatprep.mubr.msk.f32.mxu1 %vm4273_vm0, %v4274_v12  ;;  %4233 = vmatpush3.bf16.msra.mxu1 %v4232_v10  ;;  %v1983_v10 = vld [vmem:[%s5622_s7 + $0x8] sm:$0xff] }
 0x412   : > { %4234 = vmatprep.subr.bf16.mxu1 %v4272_v2 }
 0x415   : > { %4236 = vmatpush3.bf16.msra.mxu1 %v4235_v15  ;;  %v1986_v15 = vld [vmem:[%s5622_s7 + $0x20] sm:$0xff] }
 0x416   : > { %4237 = vmatprep.subr.bf16.mxu1 %v4272_v2 }
 0x419   : > { %4239 = vmatpush3.bf16.msra.mxu1 %v4238_v20  ;;  %v1989_v20 = vld [vmem:[%s5622_s7 + $0x38] sm:$0xff] }
 0x41a   : > { %4240 = vmatprep.subr.bf16.mxu1 %v4272_v2  ;;  %v1422_v2 = vld [vmem:[%s5621_s6 + $0x20] sm:$0xff] }
 0x41b   : > { %3773 = vmatprep.mubr.msk.f32.mxu0 %vm897_vm1, %v1422_v2  ;;  %v1995_v2 = vld [vmem:[%s5622_s7 + $0x68] sm:$0xff] }
 0x41c   : > { %3774 = vmatmul.mubr.msk.f32.gmra.mrb[20].mxu0 %vm897_vm1, %v1423_v28  ;;  %v1996_v28 = vld [vmem:[%s5622_s7 + $0x70] sm:$0xff] }
 0x41d   : > { %4242 = vmatpush3.bf16.msra.mxu1 %v4241_v23  ;;  %3776 = vmatprep.mubr.msk.f32.mxu0 %vm897_vm1, %v1424_v29  ;;  %v1992_v23 = vld [vmem:[%s5622_s7 + $0x50] sm:$0xff]  ;;  %v1997_v29 = vld [vmem:[%s5622_s7 + $0x78] sm:$0xff] }
 0x420   : > { %3777 = vmatmul.mubr.msk.f32.gmra.mrb[22].mxu0 %vm897_vm1, %v1425_v30  ;;  %v1998_v30 = vld [vmem:[%s5622_s7 + $0x80] sm:$0xff] }
 0x421   : > { %3779 = vmatprep.mubr.msk.f32.mxu0 %vm897_vm1, %v1426_v31  ;;  %v1999_v31 = vld [vmem:[%s5622_s7 + $0x88] sm:$0xff] }
 0x424   : > { %3780 = vmatmul.mubr.msk.f32.gmra.mrb[24].mxu0 %vm897_vm1, %v1427_v13  ;;  %v2000_v13 = vld [vmem:[%s5622_s7 + $0x90] sm:$0xff] }
 0x425   : > { %3782 = vmatprep.mubr.msk.f32.mxu0 %vm897_vm1, %v1428_v32  ;;  %v2001_v32 = vld [vmem:[%s5622_s7 + $0x98] sm:$0xff] }
 0x428   : > { %3783 = vmatmul.mubr.msk.f32.gmra.mrb[26].mxu0 %vm897_vm1, %v1429_v33  ;;  %v2002_v33 = vld [vmem:[%s5622_s7 + $0xa0] sm:$0xff] }
 0x429   : > { %3785 = vmatprep.mubr.msk.f32.mxu0 %vm897_vm1, %v1430_v34  ;;  %v2003_v34 = vld [vmem:[%s5622_s7 + $0xa8] sm:$0xff] }
 0x42c   : > { %3786 = vmatmul.mubr.msk.f32.gmra.mrb[28].mxu0 %vm897_vm1, %v1431_v37  ;;  %v2004_v37 = vld [vmem:[%s5622_s7 + $0xb0] sm:$0xff] }
 0x42d   : > { %3788 = vmatprep.mubr.msk.f32.mxu0 %vm897_vm1, %v1432_v38  ;;  %v2005_v38 = vld [vmem:[%s5622_s7 + $0xb8] sm:$0xff] }
 0x430   : > { %3789 = vmatmul.mubr.msk.f32.gmra.mrb[30].mxu0 %vm897_vm1, %v1433_v39  ;;  %v2006_v39 = vld [vmem:[%s5622_s7 + $0xc0] sm:$0xff] }
 0x431   : > { %3791 = vmatprep.mubr.msk.f32.mxu0 %vm897_vm1, %v1434_v40  ;;  %v2007_v40 = vld [vmem:[%s5622_s7 + $0xc8] sm:$0xff] }
 0x434   : > { %3792 = vmatmul.mubr.msk.f32.gmra.mrb[32].mxu0 %vm897_vm1, %v1435_v41  ;;  %v2008_v41 = vld [vmem:[%s5622_s7 + $0xd0] sm:$0xff] }
 0x435   : > { %3794 = vmatprep.mubr.msk.f32.mxu0 %vm897_vm1, %v1436_v42  ;;  %v2009_v42 = vld [vmem:[%s5622_s7 + $0xd8] sm:$0xff] }
 0x438   : > { %3795 = vmatmul.mubr.msk.f32.gmra.mrb[34].mxu0 %vm897_vm1, %v1437_v43  ;;  %v2010_v43 = vld [vmem:[%s5622_s7 + $0xe0] sm:$0xff] }
 0x439   : > { %3797 = vmatprep.mubr.msk.f32.mxu0 %vm897_vm1, %v1438_v46  ;;  %v2011_v46 = vld [vmem:[%s5622_s7 + $0xe8] sm:$0xff] }
 0x43c   : > { %3798 = vmatmul.mubr.msk.f32.gmra.mrb[36].mxu0 %vm897_vm1, %v1439_v47  ;;  %v2012_v47 = vld [vmem:[%s5622_s7 + $0xf0] sm:$0xff] }
 0x43d   : > { %3800 = vmatprep.mubr.msk.f32.mxu0 %vm897_vm1, %v1440_v48  ;;  %v2013_v48 = vld [vmem:[%s5622_s7 + $0xf8] sm:$0xff] }
 0x440   : > { %3801 = vmatmul.mubr.msk.f32.gmra.mrb[38].mxu0 %vm897_vm1, %v1441_v49  ;;  %v2586_v49 = vld [vmem:[%s5623_s8] sm:$0xff] }
 0x441   : > { %3803 = vmatprep.mubr.msk.f32.mxu0 %vm897_vm1, %v1442_v50  ;;  %v3684_v50 = vpop.f32.mrb[2].mxu0 }
 0x442   : > { %1221 = vst.msk [vmem:[%s4700_s22 + $0x8] sm:$0xff] %vm1219_vm2, %v3684_v50 }
 0x444   : > { %3804 = vmatmul.mubr.msk.f32.gmra.mrb[40].mxu0 %vm897_vm1, %v1443_v51  ;;  %v1060_v51 = vpop.f32.mrb[3].mxu0 }
 0x445   : > { %3806 = vmatprep.mubr.msk.f32.mxu0 %vm897_vm1, %v1444_v52  ;;  %1220 = vst.msk [vmem:[%s4700_s22] sm:$0xff] %vm1219_vm2, %v1060_v51  ;;  %v3687_v52 = vpop.f32.mrb[4].mxu0  ;;  %v2587_v51 = vld [vmem:[%s5623_s8 + $0x8] sm:$0xff] }
 0x446   : > { %1223 = vst.msk [vmem:[%s4700_s22 + $0x18] sm:$0xff] %vm1219_vm2, %v3687_v52  ;;  %v2588_v52 = vld [vmem:[%s5623_s8 + $0x10] sm:$0xff] }
 0x448   : > { %3807 = vmatmul.mubr.msk.f32.gmra.mrb[42].mxu0 %vm897_vm1, %v1445_v17  ;;  %v1070_v17 = vpop.f32.mrb[5].mxu0 }
 0x449   : > { %3809 = vmatprep.mubr.msk.f32.mxu0 %vm897_vm1, %v1446_v5  ;;  %1222 = vst.msk [vmem:[%s4700_s22 + $0x10] sm:$0xff] %vm1219_vm2, %v1070_v17  ;;  %v2589_v17 = vld [vmem:[%s5623_s8 + $0x18] sm:$0xff] }
 0x44c   : > { %3810 = vmatmul.mubr.msk.f32.gmra.mrb[44].mxu0 %vm897_vm1, %v1447_v6 }
 0x44d   : > { %3812 = vmatprep.mubr.msk.f32.mxu0 %vm897_vm1, %v1448_v8 }
 0x4b3   : > { %v3849_v26 = vpop.f32.mrb[28].mxu1 }
 0x4b4   : > { %v1977_v27 = vadd.f32 %v3849_v26, %v3207_v18  ;;  %v1971_v35 = vpop.f32.mrb[29].mxu1 }
 0x4b5   : > { %v1972_v36 = vadd.f32 %v3207_v18, %v1971_v35  ;;  %v3690_v18 = vpop.f32.mrb[6].mxu0 }
 0x4b6   : > { %v1981_v44 = vmax.f32 %v1977_v27, 0.0  ;;  %1225 = vst.msk [vmem:[%s4700_s22 + $0x28] sm:$0xff] %vm1219_vm2, %v3690_v18  ;;  %v1080_v26 = vpop.f32.mrb[7].mxu0  ;;  %v2590_v18 = vld [vmem:[%s5623_s8 + $0x20] sm:$0xff] }
 0x4b7   : > { %v1980_v45 = vmax.f32 %v1972_v36, 0.0  ;;  %1224 = vst.msk [vmem:[%s4700_s22 + $0x20] sm:$0xff] %vm1219_vm2, %v1080_v26  ;;  %v3693_v27 = vpop.f32.mrb[8].mxu0  ;;  %v2591_v26 = vld [vmem:[%s5623_s8 + $0x28] sm:$0xff] }
 0x4b8   : > { %1227 = vst.msk [vmem:[%s4700_s22 + $0x38] sm:$0xff] %vm1219_vm2, %v3693_v27  ;;  %v1090_v35 = vpop.f32.mrb[9].mxu0  ;;  %v2592_v27 = vld [vmem:[%s5623_s8 + $0x30] sm:$0xff] }
 0x4b9   : > { %v4183_v53 = vpack.c.bf16 %v1981_v44, %v1980_v45  ;;  %1226 = vst.msk [vmem:[%s4700_s22 + $0x30] sm:$0xff] %vm1219_vm2, %v1090_v35  ;;  %v3696_v36 = vpop.f32.mrb[10].mxu0  ;;  %v2593_v35 = vld [vmem:[%s5623_s8 + $0x38] sm:$0xff] }
 0x4ba   : > { %1229 = vst.msk [vmem:[%s4700_s22 + $0x48] sm:$0xff] %vm1219_vm2, %v3696_v36  ;;  %v1100_v44 = vpop.f32.mrb[11].mxu0  ;;  %v2594_v36 = vld [vmem:[%s5623_s8 + $0x40] sm:$0xff] }
 0x4bb   : > { %4184 = vmatprep.subr.bf16.mxu0 %v4183_v53  ;;  %1228 = vst.msk [vmem:[%s4700_s22 + $0x40] sm:$0xff] %vm1219_vm2, %v1100_v44 }
 0x4bc   : > { %4186 = vmatpush3.bf16.msra.mxu0 %v4183_v53 }
 0x4c6   : > { %v3699_v45 = vpop.f32.mrb[12].mxu0 }
 0x4c7   : > { %1231 = vst.msk [vmem:[%s4700_s22 + $0x58] sm:$0xff] %vm1219_vm2, %v3699_v45  ;;  %v1110_v53 = vpop.f32.mrb[13].mxu0 }
 0x4c8   : > { %1230 = vst.msk [vmem:[%s4700_s22 + $0x50] sm:$0xff] %vm1219_vm2, %v1110_v53  ;;  %v2595_v53 = vld [vmem:[%s5623_s8 + $0x48] sm:$0xff] }
 0x4d3   : > { %v3572_v54 = vpop.f32.mrb[30].mxu1 }
 0x4d4   : > { %v3573_v60 = vpop.f32.mrb[31].mxu1 }
 0x4d5   : > { %v3574_v61 = vadd.f32 %v3573_v60, %v3572_v54  ;;  %v3702_v54 = vpop.f32.mrb[14].mxu0 }
 0x4d6   : > { %1233 = vst.msk [vmem:[%s4700_s22 + $0x68] sm:$0xff] %vm1219_vm2, %v3702_v54  ;;  %v1120_v60 = vpop.f32.mrb[15].mxu0  ;;  %v2596_v54 = vld [vmem:[%s5623_s8 + $0x50] sm:$0xff] }
 0x4d7   : > { %v3575_v3 = vpop.f32.mrb[32].mxu1  ;;  %3935 = vmatmul.mubr.f32.vlgmr.msra.gmra.mrb[40].mxu1 %v3574_v61  ;;  %1232 = vst.msk [vmem:[%s4700_s22 + $0x60] sm:$0xff] %vm1219_vm2, %v1120_v60  ;;  %v3769_v61 = vpop.f32.mrb[16].mxu0 }
 0x4d8   : > { %v3576_v4 = vpop.f32.mrb[33].mxu1  ;;  %3937 = vmatprep.mubr.msk.f32.mxu1 %vm4273_vm0, %v4274_v12  ;;  %1772 = vst.msk [vmem:[%s5275_s9 + $0x8] sm:$0xff] %vm1219_vm2, %v3769_v61 }
 0x4d9   : > { %v3577_v7 = vadd.f32 %v3576_v4, %v3575_v3  ;;  %v1612_v3 = vpop.f32.mrb[17].mxu0 }
 0x4da   : > { %1771 = vst.msk [vmem:[%s5275_s9] sm:$0xff] %vm1219_vm2, %v1612_v3  ;;  %v3772_v4 = vpop.f32.mrb[18].mxu0  ;;  %v2597_v3 = vld [vmem:[%s5623_s8 + $0x58] sm:$0xff] }
 0x4db   : > { %3938 = vmatmul.mubr.f32.gmra.mrb[42].mxu1 %v3577_v7  ;;  %v3578_v55 = vpop.f32.mrb[34].mxu1  ;;  %1774 = vst.msk [vmem:[%s5275_s9 + $0x18] sm:$0xff] %vm1219_vm2, %v3772_v4  ;;  %v1622_v7 = vpop.f32.mrb[19].mxu0  ;;  %v2598_v4 = vld [vmem:[%s5623_s8 + $0x60] sm:$0xff] }
 0x4dc   : > { %v3579_v56 = vpop.f32.mrb[35].mxu1  ;;  %3940 = vmatprep.mubr.msk.f32.mxu1 %vm4273_vm0, %v4274_v12  ;;  %1773 = vst.msk [vmem:[%s5275_s9 + $0x10] sm:$0xff] %vm1219_vm2, %v1622_v7 }
 0x4dd   : > { %v3580_v57 = vadd.f32 %v3579_v56, %v3578_v55 }
 0x4df   : > { %v3581_v58 = vpop.f32.mrb[36].mxu1  ;;  %3941 = vmatmul.mubr.f32.gmra.mrb[44].mxu1 %v3580_v57 }
 0x4e0   : > { %v3582_v59 = vpop.f32.mrb[37].mxu1  ;;  %3943 = vmatprep.mubr.msk.f32.mxu1 %vm4273_vm0, %v4274_v12 }
 0x4e1   : > { %v3583_v62 = vadd.f32 %v3582_v59, %v3581_v58 }
 0x4e3   : > { %3944 = vmatmul.mubr.f32.gmra.mrb[46].mxu1 %v3583_v62  ;;  %v3584_v63 = vpop.f32.mrb[38].mxu1 }
 0x4e4   : > { %v3585_v0 = vpop.f32.mrb[39].mxu1  ;;  %3946 = vmatprep.mubr.msk.f32.mxu1 %vm4273_vm0, %v4274_v12  ;;  %v1449_v12 = vld [vmem:[%s5621_s6 + $0xf8] sm:$0xff] }
 0x4e5   : > { %v3586_v1 = vadd.f32 %v3585_v0, %v3584_v63  ;;  %3813 = vmatmul.mubr.msk.f32.gmra.mrb[46].mxu0 %vm897_vm1, %v1449_v12 }
 0x4e6   : > { %3854 = vmatprep.mubr.msk.f32.mxu0 %vm2014_vm3, %v1982_v9 }
 0x4e7   : > { %3947 = vmatmul.mubr.f32.gmra.mrb[48].mxu1 %v3586_v1 }
 0x4e9   : > { %3855 = vmatmul.mubr.msk.f32.vlgmr.msra.gmra.mrb[48].mxu0 %vm2014_vm3, %v1983_v10 }
 0x4ea   : > { %3857 = vmatprep.mubr.msk.f32.mxu0 %vm2014_vm3, %v1984_v11 }
 0x4ed   : > { %3858 = vmatmul.mubr.msk.f32.gmra.mrb[50].mxu0 %vm2014_vm3, %v1985_v14 }
 0x4ee   : > { %3860 = vmatprep.mubr.msk.f32.mxu0 %vm2014_vm3, %v1986_v15 }
 0x4ef   : > { %v3775_v55 = vpop.f32.mrb[20].mxu0 }
 0x4f0   : > { %1776 = vst.msk [vmem:[%s5275_s9 + $0x28] sm:$0xff] %vm1219_vm2, %v3775_v55  ;;  %v1632_v56 = vpop.f32.mrb[21].mxu0 }
 0x4f1   : > { %3861 = vmatmul.mubr.msk.f32.gmra.mrb[52].mxu0 %vm2014_vm3, %v1987_v16  ;;  %1775 = vst.msk [vmem:[%s5275_s9 + $0x20] sm:$0xff] %vm1219_vm2, %v1632_v56  ;;  %v2599_v56 = vld [vmem:[%s5623_s8 + $0x68] sm:$0xff] }
 0x4f2   : > { %3863 = vmatprep.mubr.msk.f32.mxu0 %vm2014_vm3, %v1988_v19 }
 0x4f3   : > { %v3778_v57 = vpop.f32.mrb[22].mxu0 }
 0x4f4   : > { %1778 = vst.msk [vmem:[%s5275_s9 + $0x38] sm:$0xff] %vm1219_vm2, %v3778_v57  ;;  %v1642_v58 = vpop.f32.mrb[23].mxu0  ;;  %v2600_v57 = vld [vmem:[%s5623_s8 + $0x70] sm:$0xff] }
 0x4f5   : > { %3864 = vmatmul.mubr.msk.f32.gmra.mrb[54].mxu0 %vm2014_vm3, %v1989_v20  ;;  %1777 = vst.msk [vmem:[%s5275_s9 + $0x30] sm:$0xff] %vm1219_vm2, %v1642_v58 }
 0x4f6   : > { %3866 = vmatprep.mubr.msk.f32.mxu0 %vm2014_vm3, %v1990_v21 }
 0x4f7   : > { %v3781_v59 = vpop.f32.mrb[24].mxu0 }
 0x4f8   : > { %1780 = vst.msk [vmem:[%s5275_s9 + $0x48] sm:$0xff] %vm1219_vm2, %v3781_v59  ;;  %v1652_v62 = vpop.f32.mrb[25].mxu0 }
 0x4f9   : > { %3867 = vmatmul.mubr.msk.f32.gmra.mrb[56].mxu0 %vm2014_vm3, %v1991_v22  ;;  %1779 = vst.msk [vmem:[%s5275_s9 + $0x40] sm:$0xff] %vm1219_vm2, %v1652_v62  ;;  %v2601_v62 = vld [vmem:[%s5623_s8 + $0x78] sm:$0xff] }
 0x4fa   : > { %3869 = vmatprep.mubr.msk.f32.mxu0 %vm2014_vm3, %v1992_v23 }
 0x4fb   : > { %v3784_v63 = vpop.f32.mrb[26].mxu0 }
 0x4fc   : > { %1782 = vst.msk [vmem:[%s5275_s9 + $0x58] sm:$0xff] %vm1219_vm2, %v3784_v63  ;;  %v1662_v0 = vpop.f32.mrb[27].mxu0  ;;  %v2602_v63 = vld [vmem:[%s5623_s8 + $0x80] sm:$0xff] }
 0x4fd   : > { %3870 = vmatmul.mubr.msk.f32.gmra.mrb[58].mxu0 %vm2014_vm3, %v1993_v24  ;;  %1781 = vst.msk [vmem:[%s5275_s9 + $0x50] sm:$0xff] %vm1219_vm2, %v1662_v0  ;;  %v3240_v24 = vld [vmem:[%s5631_s16] ss:$0 sm:$0xff] }
 0x4fe   : > { %3872 = vmatprep.mubr.msk.f32.mxu0 %vm2014_vm3, %v1994_v25 }
 0x4ff   : > { %v3787_v1 = vpop.f32.mrb[28].mxu0 }
 0x500   : > { %1784 = vst.msk [vmem:[%s5275_s9 + $0x68] sm:$0xff] %vm1219_vm2, %v3787_v1  ;;  %v1672_v5 = vpop.f32.mrb[29].mxu0 }
 0x501   : > { %3873 = vmatmul.mubr.msk.f32.gmra.mrb[60].mxu0 %vm2014_vm3, %v1995_v2  ;;  %1783 = vst.msk [vmem:[%s5275_s9 + $0x60] sm:$0xff] %vm1219_vm2, %v1672_v5  ;;  %v2603_v5 = vld [vmem:[%s5623_s8 + $0x88] sm:$0xff] }
 0x502   : > { %3875 = vmatprep.mubr.msk.f32.mxu0 %vm2014_vm3, %v1996_v28 }
 0x503   : > { %v3790_v6 = vpop.f32.mrb[30].mxu0 }
 0x504   : > { %1786 = vst.msk [vmem:[%s5275_s9 + $0x78] sm:$0xff] %vm1219_vm2, %v3790_v6  ;;  %v1682_v8 = vpop.f32.mrb[31].mxu0  ;;  %v2604_v6 = vld [vmem:[%s5623_s8 + $0x90] sm:$0xff] }
 0x505   : > { %3876 = vmatmul.mubr.msk.f32.gmra.mrb[62].mxu0 %vm2014_vm3, %v1997_v29  ;;  %1785 = vst.msk [vmem:[%s5275_s9 + $0x70] sm:$0xff] %vm1219_vm2, %v1682_v8 }
 0x506   : > { %3878 = vmatprep.mubr.msk.f32.mxu0 %vm2014_vm3, %v1998_v30 }
 0x507   : > { %v3793_v12 = vpop.f32.mrb[32].mxu0 }
 0x508   : > { %1788 = vst.msk [vmem:[%s5275_s9 + $0x88] sm:$0xff] %vm1219_vm2, %v3793_v12  ;;  %v1692_v9 = vpop.f32.mrb[33].mxu0 }
 0x509   : > { %3879 = vmatmul.mubr.msk.f32.gmra.mrb[64].mxu0 %vm2014_vm3, %v1999_v31  ;;  %1787 = vst.msk [vmem:[%s5275_s9 + $0x80] sm:$0xff] %vm1219_vm2, %v1692_v9  ;;  %v2605_v9 = vld [vmem:[%s5623_s8 + $0x98] sm:$0xff] }
 0x50a   : > { %3881 = vmatprep.mubr.msk.f32.mxu0 %vm2014_vm3, %v2000_v13 }
 0x50b   : > { %v3796_v10 = vpop.f32.mrb[34].mxu0 }
 0x50c   : > { %1790 = vst.msk [vmem:[%s5275_s9 + $0x98] sm:$0xff] %vm1219_vm2, %v3796_v10  ;;  %v1702_v11 = vpop.f32.mrb[35].mxu0  ;;  %v2606_v10 = vld [vmem:[%s5623_s8 + $0xa0] sm:$0xff] }
 0x50d   : > { %3882 = vmatmul.mubr.msk.f32.gmra.mrb[66].mxu0 %vm2014_vm3, %v2001_v32  ;;  %1789 = vst.msk [vmem:[%s5275_s9 + $0x90] sm:$0xff] %vm1219_vm2, %v1702_v11 }
 0x50e   : > { %3884 = vmatprep.mubr.msk.f32.mxu0 %vm2014_vm3, %v2002_v33 }
 0x50f   : > { %v3799_v14 = vpop.f32.mrb[36].mxu0 }
 0x510   : > { %1792 = vst.msk [vmem:[%s5275_s9 + $0xa8] sm:$0xff] %vm1219_vm2, %v3799_v14  ;;  %v1712_v15 = vpop.f32.mrb[37].mxu0 }
 0x511   : > { %3885 = vmatmul.mubr.msk.f32.gmra.mrb[68].mxu0 %vm2014_vm3, %v2003_v34  ;;  %1791 = vst.msk [vmem:[%s5275_s9 + $0xa0] sm:$0xff] %vm1219_vm2, %v1712_v15  ;;  %v2607_v15 = vld [vmem:[%s5623_s8 + $0xa8] sm:$0xff] }
 0x512   : > { %3887 = vmatprep.mubr.msk.f32.mxu0 %vm2014_vm3, %v2004_v37 }
 0x513   : > { %v3802_v16 = vpop.f32.mrb[38].mxu0 }
 0x514   : > { %1794 = vst.msk [vmem:[%s5275_s9 + $0xb8] sm:$0xff] %vm1219_vm2, %v3802_v16  ;;  %v1722_v19 = vpop.f32.mrb[39].mxu0  ;;  %v2608_v16 = vld [vmem:[%s5623_s8 + $0xb0] sm:$0xff] }
 0x515   : > { %3888 = vmatmul.mubr.msk.f32.gmra.mrb[70].mxu0 %vm2014_vm3, %v2005_v38  ;;  %1793 = vst.msk [vmem:[%s5275_s9 + $0xb0] sm:$0xff] %vm1219_vm2, %v1722_v19 }
 0x516   : > { %3890 = vmatprep.mubr.msk.f32.mxu0 %vm2014_vm3, %v2006_v39 }
 0x517   : > { %v3805_v20 = vpop.f32.mrb[40].mxu0 }
 0x518   : > { %1796 = vst.msk [vmem:[%s5275_s9 + $0xc8] sm:$0xff] %vm1219_vm2, %v3805_v20  ;;  %v1732_v21 = vpop.f32.mrb[41].mxu0 }
 0x519   : > { %3891 = vmatmul.mubr.msk.f32.gmra.mrb[72].mxu0 %vm2014_vm3, %v2007_v40  ;;  %1795 = vst.msk [vmem:[%s5275_s9 + $0xc0] sm:$0xff] %vm1219_vm2, %v1732_v21  ;;  %v2609_v21 = vld [vmem:[%s5623_s8 + $0xb8] sm:$0xff] }
 0x51a   : > { %3893 = vmatprep.mubr.msk.f32.mxu0 %vm2014_vm3, %v2008_v41 }
 0x51b   : > { %v3808_v22 = vpop.f32.mrb[42].mxu0 }
 0x51c   : > { %1798 = vst.msk [vmem:[%s5275_s9 + $0xd8] sm:$0xff] %vm1219_vm2, %v3808_v22  ;;  %v1742_v23 = vpop.f32.mrb[43].mxu0  ;;  %v2610_v22 = vld [vmem:[%s5623_s8 + $0xc0] sm:$0xff] }
 0x51d   : > { %3894 = vmatmul.mubr.msk.f32.gmra.mrb[74].mxu0 %vm2014_vm3, %v2009_v42  ;;  %1797 = vst.msk [vmem:[%s5275_s9 + $0xd0] sm:$0xff] %vm1219_vm2, %v1742_v23 }
 0x51e   : > { %3896 = vmatprep.mubr.msk.f32.mxu0 %vm2014_vm3, %v2010_v43 }
 0x51f   : > { %v3811_v44 = vpop.f32.mrb[44].mxu0 }
 0x520   : > { %1800 = vst.msk [vmem:[%s5275_s9 + $0xe8] sm:$0xff] %vm1219_vm2, %v3811_v44  ;;  %v1752_v45 = vpop.f32.mrb[45].mxu0 }
 0x521   : > { %3897 = vmatmul.mubr.msk.f32.gmra.mrb[76].mxu0 %vm2014_vm3, %v2011_v46  ;;  %1799 = vst.msk [vmem:[%s5275_s9 + $0xe0] sm:$0xff] %vm1219_vm2, %v1752_v45 }
 0x522   : > { %3899 = vmatprep.mubr.msk.f32.mxu0 %vm2014_vm3, %v2012_v47 }
 0x525   : > { %3900 = vmatmul.mubr.msk.f32.gmra.mrb[78].mxu0 %vm2014_vm3, %v2013_v48 }
 0x526   : > { %3959 = vmatprep.mubr.msk.f32.mxu0 %vm2618_vm4, %v2586_v49 }
 0x5aa   : > { %v2557_v25 = vpop.f32.mrb[40].mxu1 }
 0x5ab   : > { %v3936_v2 = vpop.f32.mrb[41].mxu1  ;;  %v2558_v28 = vadd.f32 %v3240_v24, %v2557_v25  ;;  %v2611_v25 = vld [vmem:[%s5623_s8 + $0xc8] sm:$0xff] }
 0x5ac   : > { %v2612_v2 = vld [vmem:[%s5623_s8 + $0xd0] sm:$0xff] }
 0x5ad   : > { %v2581_v13 = vmax.f32 %v2558_v28, 0.0 }
 0x5ae   : > { %v2562_v29 = vpop.f32.mrb[42].mxu1 }
 0x5af   : > { %v2563_v30 = vadd.f32 %v3240_v24, %v2562_v29  ;;  %v3939_v31 = vpop.f32.mrb[43].mxu1 }
 0x5b0   : > { %v2614_v31 = vld [vmem:[%s5623_s8 + $0xe0] sm:$0xff] }
 0x5b1   : > { %v2582_v32 = vmax.f32 %v2563_v30, 0.0  ;;  %v2613_v30 = vld [vmem:[%s5623_s8 + $0xd8] sm:$0xff] }
 0x5b2   : > { %v2567_v33 = vpop.f32.mrb[44].mxu1 }
 0x5b3   : > { %v4243_v34 = vpack.c.bf16 %v2582_v32, %v2581_v13  ;;  %v3942_v37 = vpop.f32.mrb[45].mxu1  ;;  %v2568_v38 = vadd.f32 %v3240_v24, %v2567_v33  ;;  %v2615_v33 = vld [vmem:[%s5623_s8 + $0xe8] sm:$0xff] }
 0x5b5   : > { %4244 = vmatprep.subr.bf16.mxu0 %v4243_v34  ;;  %v2583_v42 = vmax.f32 %v2568_v38, 0.0 }
 0x5b6   : > { %4246 = vmatpush3.bf16.msra.mxu0 %v4243_v34  ;;  %v2572_v39 = vpop.f32.mrb[46].mxu1  ;;  %v2616_v34 = vld [vmem:[%s5623_s8 + $0xf0] sm:$0xff] }
 0x5b7   : > { %v2573_v40 = vadd.f32 %v3240_v24, %v2572_v39  ;;  %v3945_v41 = vpop.f32.mrb[47].mxu1  ;;  %v2617_v39 = vld [vmem:[%s5623_s8 + $0xf8] sm:$0xff] }
 0x5b8   : > { %v3814_v60 = vpop.f32.mrb[46].mxu0 }
 0x5b9   : > { %v2584_v43 = vmax.f32 %v2573_v40, 0.0  ;;  %1802 = vst.msk [vmem:[%s5275_s9 + $0xf8] sm:$0xff] %vm1219_vm2, %v3814_v60  ;;  %v1762_v61 = vpop.f32.mrb[47].mxu0 }
 0x5ba   : > { %v2577_v46 = vpop.f32.mrb[48].mxu1  ;;  %1801 = vst.msk [vmem:[%s5275_s9 + $0xf0] sm:$0xff] %vm1219_vm2, %v1762_v61  ;;  %s5546_s9 = scalar_lea.vmem %s5635_s20, %s4404_s0 }
 0x5bb   : > { %v4247_v47 = vpack.c.bf16 %v2584_v43, %v2583_v42  ;;  %v2578_v48 = vadd.f32 %v3240_v24, %v2577_v46  ;;  %v3948_v49 = vpop.f32.mrb[49].mxu1 }
 0x5bc   : > { %v3856_v7 = vpop.f32.mrb[48].mxu0 }
 0x5bd   : > { %4248 = vmatprep.subr.bf16.mxu0 %v4247_v47  ;;  %v2585_v50 = vmax.f32 %v2578_v48, 0.0  ;;  %2337 = vst.msk [vmem:[%s5391_s25 + $0x8] sm:$0xff] %vm1219_vm2, %v3856_v7  ;;  %v2177_v55 = vpop.f32.mrb[49].mxu0 }
 0x5be   : > { %4250 = vmatpush3.bf16.msra.mxu0 %v4247_v47  ;;  %2336 = vst.msk [vmem:[%s5391_s25] sm:$0xff] %vm1219_vm2, %v2177_v55 }
 0x5bf   : > { %3957 = vmatprep.subr.mxu0 %v2585_v50 }
 0x5c0   : > { %v3859_v58 = vpop.f32.mrb[50].mxu0 }
 0x5c1   : > { %2339 = vst.msk [vmem:[%s5391_s25 + $0x18] sm:$0xff] %vm1219_vm2, %v3859_v58  ;;  %v2187_v59 = vpop.f32.mrb[51].mxu0 }
 0x5c2   : > { %3958 = vmatpush3.msra.mxu0 %v2585_v50  ;;  %2338 = vst.msk [vmem:[%s5391_s25 + $0x10] sm:$0xff] %vm1219_vm2, %v2187_v59 }
 0x5c3   : > { %3960 = vmatmul.mubr.msk.f32.vlgmr.msra.gmra.mrb[80].mxu0 %vm2618_vm4, %v2587_v51 }
 0x5c4   : > { %3962 = vmatprep.mubr.msk.f32.mxu0 %vm2618_vm4, %v2588_v52  ;;  %v3862_v0 = vpop.f32.mrb[52].mxu0 }
 0x5c5   : > { %2341 = vst.msk [vmem:[%s5391_s25 + $0x28] sm:$0xff] %vm1219_vm2, %v3862_v0  ;;  %v2197_v1 = vpop.f32.mrb[53].mxu0 }
 0x5c6   : > { %2340 = vst.msk [vmem:[%s5391_s25 + $0x20] sm:$0xff] %vm1219_vm2, %v2197_v1 }
 0x5c7   : > { %3963 = vmatmul.mubr.msk.f32.gmra.mrb[82].mxu0 %vm2618_vm4, %v2589_v17 }
 0x5c8   : > { %3965 = vmatprep.mubr.msk.f32.mxu0 %vm2618_vm4, %v2590_v18  ;;  %v3865_v8 = vpop.f32.mrb[54].mxu0 }
 0x5c9   : > { %2343 = vst.msk [vmem:[%s5391_s25 + $0x38] sm:$0xff] %vm1219_vm2, %v3865_v8  ;;  %v2207_v12 = vpop.f32.mrb[55].mxu0 }
 0x5ca   : > { %2342 = vst.msk [vmem:[%s5391_s25 + $0x30] sm:$0xff] %vm1219_vm2, %v2207_v12 }
 0x5cb   : > { %3966 = vmatmul.mubr.msk.f32.gmra.mrb[84].mxu0 %vm2618_vm4, %v2591_v26 }
 0x5cc   : > { %3968 = vmatprep.mubr.msk.f32.mxu0 %vm2618_vm4, %v2592_v27  ;;  %v3868_v11 = vpop.f32.mrb[56].mxu0 }
 0x5cd   : > { %2345 = vst.msk [vmem:[%s5391_s25 + $0x48] sm:$0xff] %vm1219_vm2, %v3868_v11  ;;  %v2217_v14 = vpop.f32.mrb[57].mxu0 }
 0x5ce   : > { %2344 = vst.msk [vmem:[%s5391_s25 + $0x40] sm:$0xff] %vm1219_vm2, %v2217_v14 }
 0x5cf   : > { %3969 = vmatmul.mubr.msk.f32.gmra.mrb[86].mxu0 %vm2618_vm4, %v2593_v35 }
 0x5d0   : > { %3971 = vmatprep.mubr.msk.f32.mxu0 %vm2618_vm4, %v2594_v36  ;;  %v3871_v19 = vpop.f32.mrb[58].mxu0 }
 0x5d1   : > { %2347 = vst.msk [vmem:[%s5391_s25 + $0x58] sm:$0xff] %vm1219_vm2, %v3871_v19  ;;  %v2227_v20 = vpop.f32.mrb[59].mxu0 }
 0x5d2   : > { %2346 = vst.msk [vmem:[%s5391_s25 + $0x50] sm:$0xff] %vm1219_vm2, %v2227_v20 }
 0x5d3   : > { %3972 = vmatmul.mubr.msk.f32.gmra.mrb[88].mxu0 %vm2618_vm4, %v2595_v53 }
 0x5d4   : > { %3974 = vmatprep.mubr.msk.f32.mxu0 %vm2618_vm4, %v2596_v54  ;;  %v3874_v23 = vpop.f32.mrb[60].mxu0 }
 0x5d5   : > { %2349 = vst.msk [vmem:[%s5391_s25 + $0x68] sm:$0xff] %vm1219_vm2, %v3874_v23  ;;  %v2237_v24 = vpop.f32.mrb[61].mxu0 }
 0x5d6   : > { %2348 = vst.msk [vmem:[%s5391_s25 + $0x60] sm:$0xff] %vm1219_vm2, %v2237_v24 }
 0x5d7   : > { %3975 = vmatmul.mubr.msk.f32.gmra.mrb[90].mxu0 %vm2618_vm4, %v2597_v3 }
 0x5d8   : > { %3977 = vmatprep.mubr.msk.f32.mxu0 %vm2618_vm4, %v2598_v4  ;;  %v3877_v28 = vpop.f32.mrb[62].mxu0 }
 0x5d9   : > { %2351 = vst.msk [vmem:[%s5391_s25 + $0x78] sm:$0xff] %vm1219_vm2, %v3877_v28  ;;  %v2247_v29 = vpop.f32.mrb[63].mxu0 }
 0x5da   : > { %2350 = vst.msk [vmem:[%s5391_s25 + $0x70] sm:$0xff] %vm1219_vm2, %v2247_v29 }
 0x5db   : > { %3978 = vmatmul.mubr.msk.f32.gmra.mrb[92].mxu0 %vm2618_vm4, %v2599_v56 }
 0x5dc   : > { %3980 = vmatprep.mubr.msk.f32.mxu0 %vm2618_vm4, %v2600_v57  ;;  %v3880_v13 = vpop.f32.mrb[64].mxu0 }
 0x5dd   : > { %2353 = vst.msk [vmem:[%s5391_s25 + $0x88] sm:$0xff] %vm1219_vm2, %v3880_v13  ;;  %v2257_v32 = vpop.f32.mrb[65].mxu0 }
 0x5de   : > { %2352 = vst.msk [vmem:[%s5391_s25 + $0x80] sm:$0xff] %vm1219_vm2, %v2257_v32 }
 0x5df   : > { %3981 = vmatmul.mubr.msk.f32.gmra.mrb[94].mxu0 %vm2618_vm4, %v2601_v62 }
 0x5e0   : > { %3983 = vmatprep.mubr.msk.f32.mxu0 %vm2618_vm4, %v2602_v63  ;;  %v3883_v37 = vpop.f32.mrb[66].mxu0 }
 0x5e1   : > { %2355 = vst.msk [vmem:[%s5391_s25 + $0x98] sm:$0xff] %vm1219_vm2, %v3883_v37  ;;  %v2267_v38 = vpop.f32.mrb[67].mxu0 }
 0x5e2   : > { %2354 = vst.msk [vmem:[%s5391_s25 + $0x90] sm:$0xff] %vm1219_vm2, %v2267_v38 }
 0x5e3   : > { %3984 = vmatmul.mubr.msk.f32.gmra.mrb[96].mxu0 %vm2618_vm4, %v2603_v5 }
 0x5e4   : > { %3986 = vmatprep.mubr.msk.f32.mxu0 %vm2618_vm4, %v2604_v6  ;;  %v3886_v40 = vpop.f32.mrb[68].mxu0 }
 0x5e5   : > { %2357 = vst.msk [vmem:[%s5391_s25 + $0xa8] sm:$0xff] %vm1219_vm2, %v3886_v40  ;;  %v2277_v41 = vpop.f32.mrb[69].mxu0 }
 0x5e6   : > { %2356 = vst.msk [vmem:[%s5391_s25 + $0xa0] sm:$0xff] %vm1219_vm2, %v2277_v41 }
 0x5e7   : > { %3987 = vmatmul.mubr.msk.f32.gmra.mrb[98].mxu0 %vm2618_vm4, %v2605_v9 }
 0x5e8   : > { %3989 = vmatprep.mubr.msk.f32.mxu0 %vm2618_vm4, %v2606_v10  ;;  %v3889_v42 = vpop.f32.mrb[70].mxu0 }
 0x5e9   : > { %2359 = vst.msk [vmem:[%s5391_s25 + $0xb8] sm:$0xff] %vm1219_vm2, %v3889_v42  ;;  %v2287_v43 = vpop.f32.mrb[71].mxu0 }
 0x5ea   : > { %2358 = vst.msk [vmem:[%s5391_s25 + $0xb0] sm:$0xff] %vm1219_vm2, %v2287_v43 }
 0x5eb   : > { %3990 = vmatmul.mubr.msk.f32.gmra.mrb[100].mxu0 %vm2618_vm4, %v2607_v15 }
 0x5ec   : > { %3992 = vmatprep.mubr.msk.f32.mxu0 %vm2618_vm4, %v2608_v16  ;;  %v3892_v46 = vpop.f32.mrb[72].mxu0 }
 0x5ed   : > { %2361 = vst.msk [vmem:[%s5391_s25 + $0xc8] sm:$0xff] %vm1219_vm2, %v3892_v46  ;;  %v2297_v47 = vpop.f32.mrb[73].mxu0 }
 0x5ee   : > { %2360 = vst.msk [vmem:[%s5391_s25 + $0xc0] sm:$0xff] %vm1219_vm2, %v2297_v47 }
 0x5ef   : > { %3993 = vmatmul.mubr.msk.f32.gmra.mrb[102].mxu0 %vm2618_vm4, %v2609_v21 }
 0x5f0   : > { %3995 = vmatprep.mubr.msk.f32.mxu0 %vm2618_vm4, %v2610_v22  ;;  %v3895_v48 = vpop.f32.mrb[74].mxu0 }
 0x5f1   : > { %2363 = vst.msk [vmem:[%s5391_s25 + $0xd8] sm:$0xff] %vm1219_vm2, %v3895_v48  ;;  %v2307_v49 = vpop.f32.mrb[75].mxu0 }
 0x5f2   : > { %2362 = vst.msk [vmem:[%s5391_s25 + $0xd0] sm:$0xff] %vm1219_vm2, %v2307_v49 }
 0x5f3   : > { %3996 = vmatmul.mubr.msk.f32.gmra.mrb[104].mxu0 %vm2618_vm4, %v2611_v25 }
 0x5f4   : > { %3998 = vmatprep.mubr.msk.f32.mxu0 %vm2618_vm4, %v2612_v2  ;;  %v3898_v50 = vpop.f32.mrb[76].mxu0 }
 0x5f5   : > { %2365 = vst.msk [vmem:[%s5391_s25 + $0xe8] sm:$0xff] %vm1219_vm2, %v3898_v50  ;;  %v2317_v51 = vpop.f32.mrb[77].mxu0 }
 0x5f6   : > { %2364 = vst.msk [vmem:[%s5391_s25 + $0xe0] sm:$0xff] %vm1219_vm2, %v2317_v51 }
 0x5f7   : > { %3999 = vmatmul.mubr.msk.f32.gmra.mrb[106].mxu0 %vm2618_vm4, %v2613_v30 }
 0x5f8   : > { %4001 = vmatprep.mubr.msk.f32.mxu0 %vm2618_vm4, %v2614_v31  ;;  %v3901_v52 = vpop.f32.mrb[78].mxu0 }
 0x5f9   : > { %2367 = vst.msk [vmem:[%s5391_s25 + $0xf8] sm:$0xff] %vm1219_vm2, %v3901_v52  ;;  %v2327_v17 = vpop.f32.mrb[79].mxu0 }
 0x5fa   : > { %2366 = vst.msk [vmem:[%s5391_s25 + $0xf0] sm:$0xff] %vm1219_vm2, %v2327_v17 }
 0x5fb   : > { %4002 = vmatmul.mubr.msk.f32.gmra.mrb[108].mxu0 %vm2618_vm4, %v2615_v33 }
 0x5fc   : > { %4004 = vmatprep.mubr.msk.f32.mxu0 %vm2618_vm4, %v2616_v34 }
 0x5ff   : > { %4005 = vmatmul.mubr.msk.f32.gmra.mrb[110].mxu0 %vm2618_vm4, %v2617_v39 }
 0x696   : > { %v3961_v18 = vpop.f32.mrb[80].mxu0 }
 0x697   : > { %2941 = vst.msk [vmem:[%s5546_s9 + $0x8] sm:$0xff] %vm1219_vm2, %v3961_v18  ;;  %v2781_v26 = vpop.f32.mrb[81].mxu0 }
 0x698   : > { %2940 = vst.msk [vmem:[%s5546_s9] sm:$0xff] %vm1219_vm2, %v2781_v26 }
 0x69a   : > { %v3964_v27 = vpop.f32.mrb[82].mxu0 }
 0x69b   : > { %2943 = vst.msk [vmem:[%s5546_s9 + $0x18] sm:$0xff] %vm1219_vm2, %v3964_v27  ;;  %v2791_v35 = vpop.f32.mrb[83].mxu0 }
 0x69c   : > { %2942 = vst.msk [vmem:[%s5546_s9 + $0x10] sm:$0xff] %vm1219_vm2, %v2791_v35 }
 0x69e   : > { %v3967_v36 = vpop.f32.mrb[84].mxu0 }
 0x69f   : > { %2945 = vst.msk [vmem:[%s5546_s9 + $0x28] sm:$0xff] %vm1219_vm2, %v3967_v36  ;;  %v2801_v44 = vpop.f32.mrb[85].mxu0 }
 0x6a0   : > { %2944 = vst.msk [vmem:[%s5546_s9 + $0x20] sm:$0xff] %vm1219_vm2, %v2801_v44 }
 0x6a2   : > { %v3970_v45 = vpop.f32.mrb[86].mxu0 }
 0x6a3   : > { %2947 = vst.msk [vmem:[%s5546_s9 + $0x38] sm:$0xff] %vm1219_vm2, %v3970_v45  ;;  %v2811_v53 = vpop.f32.mrb[87].mxu0 }
 0x6a4   : > { %2946 = vst.msk [vmem:[%s5546_s9 + $0x30] sm:$0xff] %vm1219_vm2, %v2811_v53 }
 0x6a6   : > { %v3973_v54 = vpop.f32.mrb[88].mxu0 }
 0x6a7   : > { %2949 = vst.msk [vmem:[%s5546_s9 + $0x48] sm:$0xff] %vm1219_vm2, %v3973_v54  ;;  %v2821_v60 = vpop.f32.mrb[89].mxu0 }
 0x6a8   : > { %2948 = vst.msk [vmem:[%s5546_s9 + $0x40] sm:$0xff] %vm1219_vm2, %v2821_v60 }
 0x6aa   : > { %v3976_v61 = vpop.f32.mrb[90].mxu0 }
 0x6ab   : > { %2951 = vst.msk [vmem:[%s5546_s9 + $0x58] sm:$0xff] %vm1219_vm2, %v3976_v61  ;;  %v2831_v3 = vpop.f32.mrb[91].mxu0 }
 0x6ac   : > { %2950 = vst.msk [vmem:[%s5546_s9 + $0x50] sm:$0xff] %vm1219_vm2, %v2831_v3 }
 0x6ae   : > { %v3979_v4 = vpop.f32.mrb[92].mxu0 }
 0x6af   : > { %2953 = vst.msk [vmem:[%s5546_s9 + $0x68] sm:$0xff] %vm1219_vm2, %v3979_v4  ;;  %v2841_v7 = vpop.f32.mrb[93].mxu0 }
 0x6b0   : > { %2952 = vst.msk [vmem:[%s5546_s9 + $0x60] sm:$0xff] %vm1219_vm2, %v2841_v7 }
 0x6b2   : > { %v3982_v55 = vpop.f32.mrb[94].mxu0 }
 0x6b3   : > { %2955 = vst.msk [vmem:[%s5546_s9 + $0x78] sm:$0xff] %vm1219_vm2, %v3982_v55  ;;  %v2851_v56 = vpop.f32.mrb[95].mxu0 }
 0x6b4   : > { %2954 = vst.msk [vmem:[%s5546_s9 + $0x70] sm:$0xff] %vm1219_vm2, %v2851_v56 }
 0x6b6   : > { %v3985_v57 = vpop.f32.mrb[96].mxu0 }
 0x6b7   : > { %2957 = vst.msk [vmem:[%s5546_s9 + $0x88] sm:$0xff] %vm1219_vm2, %v3985_v57  ;;  %v2861_v58 = vpop.f32.mrb[97].mxu0 }
 0x6b8   : > { %2956 = vst.msk [vmem:[%s5546_s9 + $0x80] sm:$0xff] %vm1219_vm2, %v2861_v58 }
 0x6ba   : > { %v3988_v59 = vpop.f32.mrb[98].mxu0 }
 0x6bb   : > { %2959 = vst.msk [vmem:[%s5546_s9 + $0x98] sm:$0xff] %vm1219_vm2, %v3988_v59  ;;  %v2871_v62 = vpop.f32.mrb[99].mxu0 }
 0x6bc   : > { %2958 = vst.msk [vmem:[%s5546_s9 + $0x90] sm:$0xff] %vm1219_vm2, %v2871_v62 }
 0x6be   : > { %v3991_v63 = vpop.f32.mrb[100].mxu0 }
 0x6bf   : > { %2961 = vst.msk [vmem:[%s5546_s9 + $0xa8] sm:$0xff] %vm1219_vm2, %v3991_v63  ;;  %v2881_v0 = vpop.f32.mrb[101].mxu0 }
 0x6c0   : > { %2960 = vst.msk [vmem:[%s5546_s9 + $0xa0] sm:$0xff] %vm1219_vm2, %v2881_v0 }
 0x6c2   : > { %v3994_v1 = vpop.f32.mrb[102].mxu0 }
 0x6c3   : > { %2963 = vst.msk [vmem:[%s5546_s9 + $0xb8] sm:$0xff] %vm1219_vm2, %v3994_v1  ;;  %v2891_v5 = vpop.f32.mrb[103].mxu0 }
 0x6c4   : > { %2962 = vst.msk [vmem:[%s5546_s9 + $0xb0] sm:$0xff] %vm1219_vm2, %v2891_v5 }
 0x6c6   : > { %v3997_v6 = vpop.f32.mrb[104].mxu0 }
 0x6c7   : > { %2965 = vst.msk [vmem:[%s5546_s9 + $0xc8] sm:$0xff] %vm1219_vm2, %v3997_v6  ;;  %v2901_v8 = vpop.f32.mrb[105].mxu0 }
 0x6c8   : > { %2964 = vst.msk [vmem:[%s5546_s9 + $0xc0] sm:$0xff] %vm1219_vm2, %v2901_v8 }
 0x6ca   : > { %v4000_v12 = vpop.f32.mrb[106].mxu0 }
 0x6cb   : > { %2967 = vst.msk [vmem:[%s5546_s9 + $0xd8] sm:$0xff] %vm1219_vm2, %v4000_v12  ;;  %v2911_v9 = vpop.f32.mrb[107].mxu0 }
 0x6cc   : > { %2966 = vst.msk [vmem:[%s5546_s9 + $0xd0] sm:$0xff] %vm1219_vm2, %v2911_v9 }
 0x6ce   : > { %v4003_v10 = vpop.f32.mrb[108].mxu0 }
 0x6cf   : > { %2969 = vst.msk [vmem:[%s5546_s9 + $0xe8] sm:$0xff] %vm1219_vm2, %v4003_v10  ;;  %v2921_v11 = vpop.f32.mrb[109].mxu0 }
 0x6d0   : > { %2968 = vst.msk [vmem:[%s5546_s9 + $0xe0] sm:$0xff] %vm1219_vm2, %v2921_v11 }
 0x6d2   : > { %v4006_v14 = vpop.f32.mrb[110].mxu0 }
 0x6d3   : > { %2971 = vst.msk [vmem:[%s5546_s9 + $0xf8] sm:$0xff] %vm1219_vm2, %v4006_v14  ;;  %v2931_v15 = vpop.f32.mrb[111].mxu0 }
 0x6d4   : > { %2970 = vst.msk [vmem:[%s5546_s9 + $0xf0] sm:$0xff] %vm1219_vm2, %v2931_v15 }
 0x6d5 PF: > { %s31_s1 = sadd.s32 1, %s4270_s1  }
 0x6d6   : > { %p28_p4 = scmp.ge.s32.totalorder %s31_s1, 4  }
 0x6d8   :  { %30 = sbr.rel (!%p28_p4) target bundleno = 7 (0x7), region = 154 }

</bundles_post_ra>
